<compile_context>
chip_gen: v5e
topology: v5e:2x2
jax: 0.10.0
libtpu: 0.0.40
codegen_flags: <defaults>
</compile_context>

<pallas_src>
import functools

import jax
import jax.numpy as jnp
from jax.experimental import pallas as pl
from jax.experimental.pallas import tpu as pltpu

# ---------------- config (scaled-down BERT) ----------------
B = 2           # batch
S = 8           # sequence length
H = 32          # hidden size            (1024 in the real model)
NH = 4          # attention heads        (16 in the real model)
DH = H // NH    # head dim
FF = 64         # intermediate size      (4096 in the real model)
LAYERS = 2      # transformer layers     (24 in the real model)
VOCAB = 64
TYPES = 2
MAXPOS = 64
CLASSES = 987   # matches nn.Linear(1024, 987)
CLS_PAD = 1024  # classifier columns padded to a multiple of 128 for lane-dense stores
P_DROP = 0.3
LN_EPS = 1e-12
ATTN_SCALE = 1.0 / (DH ** 0.5)

VMEM_LIMIT = 32 * 1024 * 1024  # safe scoped-VMEM budget on v5e/v6e/v7x


# ---------------- in-kernel helpers (pure jnp, f32) ----------------
def _ln(x, g, b):
    mu = jnp.mean(x, axis=-1, keepdims=True)
    d = x - mu
    var = jnp.mean(d * d, axis=-1, keepdims=True)
    return d * jax.lax.rsqrt(var + LN_EPS) * g + b


def _gelu(x):
    # TODO(synk): HuggingFace BERT uses erf-GELU; tanh approximation keeps lowering simple.
    return 0.5 * x * (1.0 + jnp.tanh(0.7978845608028654 * (x + 0.044715 * x * x * x)))


def _row_tile(m, cap=256):
    if m <= cap:
        return m
    t = cap
    while m % t:
        t -= 8
    return t


# ---------------- Pallas kernels ----------------
def _ln_kernel(x_ref, g_ref, b_ref, o_ref):
    o_ref[...] = _ln(x_ref[...], g_ref[...], b_ref[...])


def _attn_block_kernel(h_ref, m_ref, wqkv_ref, bqkv_ref, wo_ref, bo_ref, g_ref, b_ref, o_ref):
    """One batch element: fused QKV proj -> per-head softmax attention -> out proj -> add+LN."""
    x = h_ref[0]                                                   # (S, H) f32
    amask = m_ref[0]                                               # (1, S) additive mask

    # fused QKV projection (one wide matmul instead of three)
    qkv = jnp.dot(x.astype(jnp.bfloat16), wqkv_ref[...],
                  preferred_element_type=jnp.float32) + bqkv_ref[...]   # (S, 3H) f32

    # per-head attention (static unrolled loop; NH is small), softmax stats in f32
    ctx_parts = []
    for hh in range(NH):
        q_h = qkv[:, hh * DH:(hh + 1) * DH]                        # (S, DH)
        k_h = qkv[:, H + hh * DH:H + (hh + 1) * DH]
        v_h = qkv[:, 2 * H + hh * DH:2 * H + (hh + 1) * DH]
        s = jnp.dot(q_h, k_h.T, preferred_element_type=jnp.float32) * ATTN_SCALE + amask
        s = s - jnp.max(s, axis=-1, keepdims=True)
        p = jnp.exp(s)
        p = p / jnp.sum(p, axis=-1, keepdims=True)
        ctx_parts.append(jnp.dot(p, v_h, preferred_element_type=jnp.float32))
    ctx = jnp.concatenate(ctx_parts, axis=-1)                      # (S, H)

    # output projection + residual + LayerNorm fused in the epilogue
    attn_out = jnp.dot(ctx.astype(jnp.bfloat16), wo_ref[...],
                       preferred_element_type=jnp.float32) + bo_ref[...]
    o_ref[0] = _ln(attn_out + x, g_ref[...], b_ref[...])


def _ffn_block_kernel(x_ref, w1_ref, b1_ref, w2_ref, b2_ref, g_ref, b_ref, o_ref):
    """Fused FFN: x @ W1 -> GELU -> @ W2 -> + residual -> LayerNorm."""
    x = x_ref[...]                                                 # (TM, H) f32
    a = jnp.dot(x.astype(jnp.bfloat16), w1_ref[...],
                preferred_element_type=jnp.float32) + b1_ref[...]
    a = _gelu(a)
    y = jnp.dot(a.astype(jnp.bfloat16), w2_ref[...],
                preferred_element_type=jnp.float32) + b2_ref[...]
    o_ref[...] = _ln(y + x, g_ref[...], b_ref[...])


def _head_kernel(cls_ref, keep_ref, pw_ref, pb_ref, cw_ref, cb_ref, o_ref):
    """Fused pooler tanh(W@cls) -> dropout (precomputed scaled keep-mask) -> padded classifier."""
    pooled = jnp.tanh(jnp.dot(cls_ref[...].astype(jnp.bfloat16), pw_ref[...],
                              preferred_element_type=jnp.float32) + pb_ref[...])
    dropped = pooled * keep_ref[...]                               # train-mode dropout
    o_ref[...] = jnp.dot(dropped.astype(jnp.bfloat16), cw_ref[...],
                         preferred_element_type=jnp.float32) + cb_ref[...]


# ---------------- pallas_call wrappers ----------------
def layer_norm(x, gamma, beta):
    M, Hd = x.shape
    tm = _row_tile(M)
    return pl.pallas_call(
        _ln_kernel,
        out_shape=jax.ShapeDtypeStruct((M, Hd), jnp.float32),
        grid=(pl.cdiv(M, tm),),
        in_specs=[
            pl.BlockSpec((tm, Hd), lambda i: (i, 0)),
            pl.BlockSpec((1, Hd), lambda i: (0, 0)),
            pl.BlockSpec((1, Hd), lambda i: (0, 0)),
        ],
        out_specs=pl.BlockSpec((tm, Hd), lambda i: (i, 0)),
        compiler_params=pltpu.CompilerParams(dimension_semantics=("parallel",)),
    )(x, gamma.reshape(1, Hd), beta.reshape(1, Hd))


def attn_block(h, lp, addmask):
    """h: (B, S, H) f32; addmask: (B, 1, S) f32 -> (B, S, H) f32."""
    return pl.pallas_call(
        _attn_block_kernel,
        out_shape=jax.ShapeDtypeStruct((B, S, H), jnp.float32),
        grid=(B,),
        in_specs=[
            pl.BlockSpec((1, S, H), lambda b: (b, 0, 0)),
            pl.BlockSpec((1, 1, S), lambda b: (b, 0, 0)),
            pl.BlockSpec((H, 3 * H), lambda b: (0, 0)),
            pl.BlockSpec((1, 3 * H), lambda b: (0, 0)),
            pl.BlockSpec((H, H), lambda b: (0, 0)),
            pl.BlockSpec((1, H), lambda b: (0, 0)),
            pl.BlockSpec((1, H), lambda b: (0, 0)),
            pl.BlockSpec((1, H), lambda b: (0, 0)),
        ],
        out_specs=pl.BlockSpec((1, S, H), lambda b: (b, 0, 0)),
        compiler_params=pltpu.CompilerParams(
            dimension_semantics=("parallel",), vmem_limit_bytes=VMEM_LIMIT),
    )(h, addmask,
      lp["wqkv"], lp["bqkv"].reshape(1, 3 * H),
      lp["wo"], lp["bo"].reshape(1, H),
      lp["ln1_g"].reshape(1, H), lp["ln1_b"].reshape(1, H))


def ffn_block(x, lp):
    """x: (M, H) f32 -> (M, H) f32."""
    M, Hd = x.shape
    tm = _row_tile(M)
    return pl.pallas_call(
        _ffn_block_kernel,
        out_shape=jax.ShapeDtypeStruct((M, Hd), jnp.float32),
        grid=(pl.cdiv(M, tm),),
        in_specs=[
            pl.BlockSpec((tm, Hd), lambda i: (i, 0)),
            pl.BlockSpec((Hd, FF), lambda i: (0, 0)),
            pl.BlockSpec((1, FF), lambda i: (0, 0)),
            pl.BlockSpec((FF, Hd), lambda i: (0, 0)),
            pl.BlockSpec((1, Hd), lambda i: (0, 0)),
            pl.BlockSpec((1, Hd), lambda i: (0, 0)),
            pl.BlockSpec((1, Hd), lambda i: (0, 0)),
        ],
        out_specs=pl.BlockSpec((tm, Hd), lambda i: (i, 0)),
        compiler_params=pltpu.CompilerParams(
            dimension_semantics=("parallel",), vmem_limit_bytes=VMEM_LIMIT),
    )(x, lp["w_ff1"], lp["b_ff1"].reshape(1, FF),
      lp["w_ff2"], lp["b_ff2"].reshape(1, Hd),
      lp["ln2_g"].reshape(1, Hd), lp["ln2_b"].reshape(1, Hd))


def head_block(cls_tokens, keep_mask, pool_w, pool_b, cls_w_pad, cls_b_pad):
    """(B, H) -> (B, CLS_PAD) padded logits (pooler + dropout + classifier fused)."""
    Bv, Hd = cls_tokens.shape
    return pl.pallas_call(
        _head_kernel,
        out_shape=jax.ShapeDtypeStruct((Bv, CLS_PAD), jnp.float32),
        grid=(1,),
        in_specs=[
            pl.BlockSpec((Bv, Hd), lambda i: (0, 0)),
            pl.BlockSpec((Bv, Hd), lambda i: (0, 0)),
            pl.BlockSpec((Hd, Hd), lambda i: (0, 0)),
            pl.BlockSpec((1, Hd), lambda i: (0, 0)),
            pl.BlockSpec((Hd, CLS_PAD), lambda i: (0, 0)),
            pl.BlockSpec((1, CLS_PAD), lambda i: (0, 0)),
        ],
        out_specs=pl.BlockSpec((Bv, CLS_PAD), lambda i: (0, 0)),
        compiler_params=pltpu.CompilerParams(
            dimension_semantics=("arbitrary",), vmem_limit_bytes=VMEM_LIMIT),
    )(cls_tokens, keep_mask, pool_w, pool_b.reshape(1, Hd),
      cls_w_pad, cls_b_pad.reshape(1, CLS_PAD))


# ---------------- parameter init (deterministic, synthetic) ----------------
def _normal(key, shape, scale=0.02):
    return scale * jax.random.normal(key, shape, dtype=jnp.float32)


def init_params(key):
    p = {}
    keys = iter(jax.random.split(key, 16 + LAYERS * 8))
    p["word_emb"] = _normal(next(keys), (VOCAB, H))
    p["pos_emb"] = _normal(next(keys), (MAXPOS, H))
    p["type_emb"] = _normal(next(keys), (TYPES, H))
    p["emb_ln_g"] = jnp.ones((H,), jnp.float32)
    p["emb_ln_b"] = jnp.zeros((H,), jnp.float32)
    p["layers"] = []
    for _ in range(LAYERS):
        lp = {
            # fused QKV weight (H, 3H) = concat(wq | wk | wv); stored bf16 for the MXU
            "wqkv": _normal(next(keys), (H, 3 * H)).astype(jnp.bfloat16),
            "bqkv": jnp.zeros((3 * H,), jnp.float32),
            "wo": _normal(next(keys), (H, H)).astype(jnp.bfloat16),
            "bo": jnp.zeros((H,), jnp.float32),
            "ln1_g": jnp.ones((H,), jnp.float32), "ln1_b": jnp.zeros((H,), jnp.float32),
            "w_ff1": _normal(next(keys), (H, FF)).astype(jnp.bfloat16),
            "b_ff1": jnp.zeros((FF,), jnp.float32),
            "w_ff2": _normal(next(keys), (FF, H)).astype(jnp.bfloat16),
            "b_ff2": jnp.zeros((H,), jnp.float32),
            "ln2_g": jnp.ones((H,), jnp.float32), "ln2_b": jnp.zeros((H,), jnp.float32),
        }
        p["layers"].append(lp)
    p["pool_w"] = _normal(next(keys), (H, H)).astype(jnp.bfloat16)
    p["pool_b"] = jnp.zeros((H,), jnp.float32)
    # classifier padded from 987 -> 1024 columns (zero-padded; logits sliced back to 987)
    cls_w = _normal(next(keys), (H, CLASSES))
    p["cls_w"] = jnp.zeros((H, CLS_PAD), jnp.float32).at[:, :CLASSES].set(cls_w).astype(jnp.bfloat16)
    p["cls_b"] = jnp.zeros((CLS_PAD,), jnp.float32)
    return p


# ---------------- forward pass ----------------
def bert_class_forward(params, ids, mask, token_type_ids, dropout_key):
    # --- embeddings (gathers are JAX glue; LN is a Pallas kernel) ---
    pos_ids = jnp.arange(S, dtype=jnp.int32)
    emb = (params["word_emb"][ids]
           + params["pos_emb"][pos_ids][None, :, :]
           + params["type_emb"][token_type_ids])                        # (B, S, H) f32
    h = layer_norm(emb.reshape(B * S, H), params["emb_ln_g"], params["emb_ln_b"])
    h = h.reshape(B, S, H)

    # --- additive attention mask kept at (B, 1, S); indexed per batch by BlockSpec ---
    addmask = ((1.0 - mask.astype(jnp.float32)) * -10000.0)[:, None, :]  # (B, 1, S)

    # TODO(synk): BERT's internal attention/hidden dropouts are treated as eval-mode (identity).
    for lp in params["layers"]:
        h = attn_block(h, lp, addmask)                                   # MHA + residual + LN1
        h = ffn_block(h.reshape(B * S, H), lp).reshape(B, S, H)          # FFN + residual + LN2

    # --- pooler (tanh on CLS) + Dropout(0.3) + Linear(H, 987), fused in one kernel ---
    cls = h[:, 0, :]                                                     # (B, H)
    keep = (jax.random.uniform(dropout_key, (B, H), dtype=jnp.float32) >= P_DROP)
    keep = keep.astype(jnp.float32) * (1.0 / (1.0 - P_DROP))             # scaled keep mask
    logits_pad = head_block(cls, keep, params["pool_w"], params["pool_b"],
                            params["cls_w"], params["cls_b"])            # (B, 1024)
    return logits_pad[:, :CLASSES]                                       # (B, 987)


if __name__ == "__main__":
    key = jax.random.PRNGKey(0)
    k_param, k_ids, k_drop = jax.random.split(key, 3)

    params = init_params(k_param)

    ids = jax.random.randint(k_ids, (B, S), 0, VOCAB, dtype=jnp.int32)
    mask = jnp.ones((B, S), dtype=jnp.int32).at[1, S - 2:].set(0)   # second example padded
    token_type_ids = jnp.zeros((B, S), dtype=jnp.int32)

    fwd = jax.jit(bert_class_forward)
    out = fwd(params, ids, mask, token_type_ids, k_drop)
    out = jax.block_until_ready(out)

    assert out.shape == (B, CLASSES), out.shape
    assert out.dtype == jnp.float32
    assert bool(jnp.all(jnp.isfinite(out)))
    print("KERNEL_OK")
</pallas_src>

<mosaic_0001>
module attributes {stable_mosaic.version = 11 : i64} {
  func.func @_attn_block_kernel(%arg0: i32, %arg1: memref<1x8x32xf32, #tpu.memory_space<vmem>>, %arg2: memref<1x1x8xf32, #tpu.memory_space<vmem>>, %arg3: memref<32x96xbf16, #tpu.memory_space<vmem>>, %arg4: memref<1x96xf32, #tpu.memory_space<vmem>>, %arg5: memref<32x32xbf16, #tpu.memory_space<vmem>>, %arg6: memref<1x32xf32, #tpu.memory_space<vmem>>, %arg7: memref<1x32xf32, #tpu.memory_space<vmem>>, %arg8: memref<1x32xf32, #tpu.memory_space<vmem>>, %arg9: memref<1x8x32xf32, #tpu.memory_space<vmem>>) attributes {dimension_semantics = [#tpu.dimension_semantics<parallel>], iteration_bounds = array<i64: 2>, scalar_prefetch = 0 : i64, scratch_operands = 0 : i64, tpu.core_type = #tpu.core_type<tc>, window_params = [{transform_indices = @transform_0, window_bounds = array<i64: 1, 8, 32>}, {transform_indices = @transform_1, window_bounds = array<i64: 1, 1, 8>}, {pipeline_mode = #tpu.pipeline_mode<synchronous>, transform_indices = @transform_2, window_bounds = array<i64: 32, 96>}, {pipeline_mode = #tpu.pipeline_mode<synchronous>, transform_indices = @transform_3, window_bounds = array<i64: 1, 96>}, {pipeline_mode = #tpu.pipeline_mode<synchronous>, transform_indices = @transform_4, window_bounds = array<i64: 32, 32>}, {pipeline_mode = #tpu.pipeline_mode<synchronous>, transform_indices = @transform_5, window_bounds = array<i64: 1, 32>}, {pipeline_mode = #tpu.pipeline_mode<synchronous>, transform_indices = @transform_6, window_bounds = array<i64: 1, 32>}, {pipeline_mode = #tpu.pipeline_mode<synchronous>, transform_indices = @transform_7, window_bounds = array<i64: 1, 32>}, {transform_indices = @transform_8, window_bounds = array<i64: 1, 8, 32>}]} {
    %c0 = arith.constant 0 : index
    %c0_0 = arith.constant 0 : index
    %c0_1 = arith.constant 0 : index
    %0 = vector.load %arg1[%c0, %c0_0, %c0_1] : memref<1x8x32xf32, #tpu.memory_space<vmem>>, vector<1x8x32xf32>
    %1 = vector.shape_cast %0 : vector<1x8x32xf32> to vector<8x32xf32>
    %c0_2 = arith.constant 0 : index
    %c0_3 = arith.constant 0 : index
    %c0_4 = arith.constant 0 : index
    %2 = vector.load %arg2[%c0_2, %c0_3, %c0_4] : memref<1x1x8xf32, #tpu.memory_space<vmem>>, vector<1x1x8xf32>
    %3 = vector.shape_cast %2 : vector<1x1x8xf32> to vector<1x8xf32>
    %4 = arith.truncf %1 : vector<8x32xf32> to vector<8x32xbf16>
    %c0_5 = arith.constant 0 : index
    %c0_6 = arith.constant 0 : index
    %5 = vector.load %arg3[%c0_5, %c0_6] : memref<32x96xbf16, #tpu.memory_space<vmem>>, vector<32x96xbf16>
    %cst = arith.constant dense<0.000000e+00> : vector<8x96xf32>
    %6 = tpu.matmul %4, %5, %cst {dimension_numbers = #tpu.dot_dimension_numbers<[1], [0], [0], [1], [0, 0, 1, 1], [], []>} : vector<8x32xbf16>, vector<32x96xbf16>, vector<8x96xf32> -> vector<8x96xf32>
    %c0_7 = arith.constant 0 : index
    %c0_8 = arith.constant 0 : index
    %7 = vector.load %arg4[%c0_7, %c0_8] : memref<1x96xf32, #tpu.memory_space<vmem>>, vector<1x96xf32>
    %8 = vector.broadcast %7 : vector<1x96xf32> to vector<8x96xf32>
    %9 = arith.addf %6, %8 : vector<8x96xf32>
    %10 = vector.extract_strided_slice %9 {offsets = [0, 0], sizes = [8, 8], strides = [1, 1]} : vector<8x96xf32> to vector<8x8xf32>
    %11 = vector.extract_strided_slice %9 {offsets = [0, 32], sizes = [8, 8], strides = [1, 1]} : vector<8x96xf32> to vector<8x8xf32>
    %12 = vector.extract_strided_slice %9 {offsets = [0, 64], sizes = [8, 8], strides = [1, 1]} : vector<8x96xf32> to vector<8x8xf32>
    %13 = tpu.transpose %11, [1, 0] : vector<8x8xf32> -> vector<8x8xf32>
    %cst_9 = arith.constant dense<0.000000e+00> : vector<8x8xf32>
    %14 = tpu.matmul %10, %13, %cst_9 {dimension_numbers = #tpu.dot_dimension_numbers<[1], [0], [0], [1], [0, 0, 1, 1], [], []>} : vector<8x8xf32>, vector<8x8xf32>, vector<8x8xf32> -> vector<8x8xf32>
    %cst_10 = arith.constant 0.353553385 : f32
    %15 = vector.broadcast %cst_10 : f32 to vector<8x8xf32>
    %16 = arith.mulf %14, %15 : vector<8x8xf32>
    %17 = vector.broadcast %3 : vector<1x8xf32> to vector<8x8xf32>
    %18 = arith.addf %16, %17 : vector<8x8xf32>
    %cst_11 = arith.constant dense<0xFF800000> : vector<8xf32>
    %19 = vector.multi_reduction <maximumf>, %18, %cst_11 [1] : vector<8x8xf32> to vector<8xf32>
    %20 = vector.shape_cast %19 : vector<8xf32> to vector<8x1xf32>
    %21 = vector.broadcast %20 : vector<8x1xf32> to vector<8x8xf32>
    %22 = arith.subf %18, %21 : vector<8x8xf32>
    %23 = math.exp %22 : vector<8x8xf32>
    %cst_12 = arith.constant dense<0.000000e+00> : vector<8xf32>
    %24 = vector.multi_reduction <add>, %23, %cst_12 [1] : vector<8x8xf32> to vector<8xf32>
    %25 = vector.shape_cast %24 : vector<8xf32> to vector<8x1xf32>
    %26 = vector.broadcast %25 : vector<8x1xf32> to vector<8x8xf32>
    %27 = arith.divf %23, %26 : vector<8x8xf32>
    %cst_13 = arith.constant dense<0.000000e+00> : vector<8x8xf32>
    %28 = tpu.matmul %27, %12, %cst_13 {dimension_numbers = #tpu.dot_dimension_numbers<[1], [0], [0], [1], [0, 0, 1, 1], [], []>} : vector<8x8xf32>, vector<8x8xf32>, vector<8x8xf32> -> vector<8x8xf32>
    %29 = vector.extract_strided_slice %9 {offsets = [0, 8], sizes = [8, 8], strides = [1, 1]} : vector<8x96xf32> to vector<8x8xf32>
    %30 = vector.extract_strided_slice %9 {offsets = [0, 40], sizes = [8, 8], strides = [1, 1]} : vector<8x96xf32> to vector<8x8xf32>
    %31 = vector.extract_strided_slice %9 {offsets = [0, 72], sizes = [8, 8], strides = [1, 1]} : vector<8x96xf32> to vector<8x8xf32>
    %32 = tpu.transpose %30, [1, 0] : vector<8x8xf32> -> vector<8x8xf32>
    %cst_14 = arith.constant dense<0.000000e+00> : vector<8x8xf32>
    %33 = tpu.matmul %29, %32, %cst_14 {dimension_numbers = #tpu.dot_dimension_numbers<[1], [0], [0], [1], [0, 0, 1, 1], [], []>} : vector<8x8xf32>, vector<8x8xf32>, vector<8x8xf32> -> vector<8x8xf32>
    %cst_15 = arith.constant 0.353553385 : f32
    %34 = vector.broadcast %cst_15 : f32 to vector<8x8xf32>
    %35 = arith.mulf %33, %34 : vector<8x8xf32>
    %36 = vector.broadcast %3 : vector<1x8xf32> to vector<8x8xf32>
    %37 = arith.addf %35, %36 : vector<8x8xf32>
    %cst_16 = arith.constant dense<0xFF800000> : vector<8xf32>
    %38 = vector.multi_reduction <maximumf>, %37, %cst_16 [1] : vector<8x8xf32> to vector<8xf32>
    %39 = vector.shape_cast %38 : vector<8xf32> to vector<8x1xf32>
    %40 = vector.broadcast %39 : vector<8x1xf32> to vector<8x8xf32>
    %41 = arith.subf %37, %40 : vector<8x8xf32>
    %42 = math.exp %41 : vector<8x8xf32>
    %cst_17 = arith.constant dense<0.000000e+00> : vector<8xf32>
    %43 = vector.multi_reduction <add>, %42, %cst_17 [1] : vector<8x8xf32> to vector<8xf32>
    %44 = vector.shape_cast %43 : vector<8xf32> to vector<8x1xf32>
    %45 = vector.broadcast %44 : vector<8x1xf32> to vector<8x8xf32>
    %46 = arith.divf %42, %45 : vector<8x8xf32>
    %cst_18 = arith.constant dense<0.000000e+00> : vector<8x8xf32>
    %47 = tpu.matmul %46, %31, %cst_18 {dimension_numbers = #tpu.dot_dimension_numbers<[1], [0], [0], [1], [0, 0, 1, 1], [], []>} : vector<8x8xf32>, vector<8x8xf32>, vector<8x8xf32> -> vector<8x8xf32>
    %48 = vector.extract_strided_slice %9 {offsets = [0, 16], sizes = [8, 8], strides = [1, 1]} : vector<8x96xf32> to vector<8x8xf32>
    %49 = vector.extract_strided_slice %9 {offsets = [0, 48], sizes = [8, 8], strides = [1, 1]} : vector<8x96xf32> to vector<8x8xf32>
    %50 = vector.extract_strided_slice %9 {offsets = [0, 80], sizes = [8, 8], strides = [1, 1]} : vector<8x96xf32> to vector<8x8xf32>
    %51 = tpu.transpose %49, [1, 0] : vector<8x8xf32> -> vector<8x8xf32>
    %cst_19 = arith.constant dense<0.000000e+00> : vector<8x8xf32>
    %52 = tpu.matmul %48, %51, %cst_19 {dimension_numbers = #tpu.dot_dimension_numbers<[1], [0], [0], [1], [0, 0, 1, 1], [], []>} : vector<8x8xf32>, vector<8x8xf32>, vector<8x8xf32> -> vector<8x8xf32>
    %cst_20 = arith.constant 0.353553385 : f32
    %53 = vector.broadcast %cst_20 : f32 to vector<8x8xf32>
    %54 = arith.mulf %52, %53 : vector<8x8xf32>
    %55 = vector.broadcast %3 : vector<1x8xf32> to vector<8x8xf32>
    %56 = arith.addf %54, %55 : vector<8x8xf32>
    %cst_21 = arith.constant dense<0xFF800000> : vector<8xf32>
    %57 = vector.multi_reduction <maximumf>, %56, %cst_21 [1] : vector<8x8xf32> to vector<8xf32>
    %58 = vector.shape_cast %57 : vector<8xf32> to vector<8x1xf32>
    %59 = vector.broadcast %58 : vector<8x1xf32> to vector<8x8xf32>
    %60 = arith.subf %56, %59 : vector<8x8xf32>
    %61 = math.exp %60 : vector<8x8xf32>
    %cst_22 = arith.constant dense<0.000000e+00> : vector<8xf32>
    %62 = vector.multi_reduction <add>, %61, %cst_22 [1] : vector<8x8xf32> to vector<8xf32>
    %63 = vector.shape_cast %62 : vector<8xf32> to vector<8x1xf32>
    %64 = vector.broadcast %63 : vector<8x1xf32> to vector<8x8xf32>
    %65 = arith.divf %61, %64 : vector<8x8xf32>
    %cst_23 = arith.constant dense<0.000000e+00> : vector<8x8xf32>
    %66 = tpu.matmul %65, %50, %cst_23 {dimension_numbers = #tpu.dot_dimension_numbers<[1], [0], [0], [1], [0, 0, 1, 1], [], []>} : vector<8x8xf32>, vector<8x8xf32>, vector<8x8xf32> -> vector<8x8xf32>
    %67 = vector.extract_strided_slice %9 {offsets = [0, 24], sizes = [8, 8], strides = [1, 1]} : vector<8x96xf32> to vector<8x8xf32>
    %68 = vector.extract_strided_slice %9 {offsets = [0, 56], sizes = [8, 8], strides = [1, 1]} : vector<8x96xf32> to vector<8x8xf32>
    %69 = vector.extract_strided_slice %9 {offsets = [0, 88], sizes = [8, 8], strides = [1, 1]} : vector<8x96xf32> to vector<8x8xf32>
    %70 = tpu.transpose %68, [1, 0] : vector<8x8xf32> -> vector<8x8xf32>
    %cst_24 = arith.constant dense<0.000000e+00> : vector<8x8xf32>
    %71 = tpu.matmul %67, %70, %cst_24 {dimension_numbers = #tpu.dot_dimension_numbers<[1], [0], [0], [1], [0, 0, 1, 1], [], []>} : vector<8x8xf32>, vector<8x8xf32>, vector<8x8xf32> -> vector<8x8xf32>
    %cst_25 = arith.constant 0.353553385 : f32
    %72 = vector.broadcast %cst_25 : f32 to vector<8x8xf32>
    %73 = arith.mulf %71, %72 : vector<8x8xf32>
    %74 = vector.broadcast %3 : vector<1x8xf32> to vector<8x8xf32>
    %75 = arith.addf %73, %74 : vector<8x8xf32>
    %cst_26 = arith.constant dense<0xFF800000> : vector<8xf32>
    %76 = vector.multi_reduction <maximumf>, %75, %cst_26 [1] : vector<8x8xf32> to vector<8xf32>
    %77 = vector.shape_cast %76 : vector<8xf32> to vector<8x1xf32>
    %78 = vector.broadcast %77 : vector<8x1xf32> to vector<8x8xf32>
    %79 = arith.subf %75, %78 : vector<8x8xf32>
    %80 = math.exp %79 : vector<8x8xf32>
    %cst_27 = arith.constant dense<0.000000e+00> : vector<8xf32>
    %81 = vector.multi_reduction <add>, %80, %cst_27 [1] : vector<8x8xf32> to vector<8xf32>
    %82 = vector.shape_cast %81 : vector<8xf32> to vector<8x1xf32>
    %83 = vector.broadcast %82 : vector<8x1xf32> to vector<8x8xf32>
    %84 = arith.divf %80, %83 : vector<8x8xf32>
    %cst_28 = arith.constant dense<0.000000e+00> : vector<8x8xf32>
    %85 = tpu.matmul %84, %69, %cst_28 {dimension_numbers = #tpu.dot_dimension_numbers<[1], [0], [0], [1], [0, 0, 1, 1], [], []>} : vector<8x8xf32>, vector<8x8xf32>, vector<8x8xf32> -> vector<8x8xf32>
    %86 = tpu.concatenate %28, %47, %66, %85 in 1 : vector<8x8xf32>, vector<8x8xf32>, vector<8x8xf32>, vector<8x8xf32> -> vector<8x32xf32>
    %87 = arith.truncf %86 : vector<8x32xf32> to vector<8x32xbf16>
    %c0_29 = arith.constant 0 : index
    %c0_30 = arith.constant 0 : index
    %88 = vector.load %arg5[%c0_29, %c0_30] : memref<32x32xbf16, #tpu.memory_space<vmem>>, vector<32x32xbf16>
    %cst_31 = arith.constant dense<0.000000e+00> : vector<8x32xf32>
    %89 = tpu.matmul %87, %88, %cst_31 {dimension_numbers = #tpu.dot_dimension_numbers<[1], [0], [0], [1], [0, 0, 1, 1], [], []>} : vector<8x32xbf16>, vector<32x32xbf16>, vector<8x32xf32> -> vector<8x32xf32>
    %c0_32 = arith.constant 0 : index
    %c0_33 = arith.constant 0 : index
    %90 = vector.load %arg6[%c0_32, %c0_33] : memref<1x32xf32, #tpu.memory_space<vmem>>, vector<1x32xf32>
    %91 = vector.broadcast %90 : vector<1x32xf32> to vector<8x32xf32>
    %92 = arith.addf %89, %91 : vector<8x32xf32>
    %93 = arith.addf %92, %1 : vector<8x32xf32>
    %c0_34 = arith.constant 0 : index
    %c0_35 = arith.constant 0 : index
    %94 = vector.load %arg7[%c0_34, %c0_35] : memref<1x32xf32, #tpu.memory_space<vmem>>, vector<1x32xf32>
    %c0_36 = arith.constant 0 : index
    %c0_37 = arith.constant 0 : index
    %95 = vector.load %arg8[%c0_36, %c0_37] : memref<1x32xf32, #tpu.memory_space<vmem>>, vector<1x32xf32>
    %cst_38 = arith.constant dense<0.000000e+00> : vector<8xf32>
    %96 = vector.multi_reduction <add>, %93, %cst_38 [1] : vector<8x32xf32> to vector<8xf32>
    %97 = vector.shape_cast %96 : vector<8xf32> to vector<8x1xf32>
    %cst_39 = arith.constant 3.200000e+01 : f32
    %98 = vector.broadcast %cst_39 : f32 to vector<8x1xf32>
    %99 = arith.divf %97, %98 : vector<8x1xf32>
    %100 = vector.broadcast %99 : vector<8x1xf32> to vector<8x32xf32>
    %101 = arith.subf %93, %100 : vector<8x32xf32>
    %102 = arith.mulf %101, %101 : vector<8x32xf32>
    %cst_40 = arith.constant dense<0.000000e+00> : vector<8xf32>
    %103 = vector.multi_reduction <add>, %102, %cst_40 [1] : vector<8x32xf32> to vector<8xf32>
    %104 = vector.shape_cast %103 : vector<8xf32> to vector<8x1xf32>
    %cst_41 = arith.constant 3.200000e+01 : f32
    %105 = vector.broadcast %cst_41 : f32 to vector<8x1xf32>
    %106 = arith.divf %104, %105 : vector<8x1xf32>
    %cst_42 = arith.constant 9.99999996E-13 : f32
    %107 = vector.broadcast %cst_42 : f32 to vector<8x1xf32>
    %108 = arith.addf %106, %107 : vector<8x1xf32>
    %109 = math.rsqrt %108 : vector<8x1xf32>
    %110 = vector.broadcast %109 : vector<8x1xf32> to vector<8x32xf32>
    %111 = arith.mulf %101, %110 : vector<8x32xf32>
    %112 = vector.broadcast %94 : vector<1x32xf32> to vector<8x32xf32>
    %113 = arith.mulf %111, %112 : vector<8x32xf32>
    %114 = vector.broadcast %95 : vector<1x32xf32> to vector<8x32xf32>
    %115 = arith.addf %113, %114 : vector<8x32xf32>
    %c0_43 = arith.constant 0 : index
    %c0_44 = arith.constant 0 : index
    %c0_45 = arith.constant 0 : index
    %116 = vector.load %arg9[%c0_43, %c0_44, %c0_45] : memref<1x8x32xf32, #tpu.memory_space<vmem>>, vector<1x8x32xf32>
    %117 = vector.shape_cast %116 : vector<1x8x32xf32> to vector<8x32xf32>
    %118 = vector.shape_cast %115 : vector<8x32xf32> to vector<1x8x32xf32>
    tpu.vector_store %arg9[%c0_43, %c0_44, %c0_45], %118 {strides = array<i32>} : memref<1x8x32xf32, #tpu.memory_space<vmem>>, vector<1x8x32xf32>,
    return
  }
  func.func @transform_0(%arg0: i32) -> (i32, i32, i32) {
    %c0_i32 = arith.constant 0 : i32
    %c0_i32_0 = arith.constant 0 : i32
    %c0_i32_1 = arith.constant 0 : i32
    return %arg0, %c0_i32, %c0_i32_0 : i32, i32, i32
  }
  func.func @transform_1(%arg0: i32) -> (i32, i32, i32) {
    %c0_i32 = arith.constant 0 : i32
    %c0_i32_0 = arith.constant 0 : i32
    %c0_i32_1 = arith.constant 0 : i32
    return %arg0, %c0_i32, %c0_i32_0 : i32, i32, i32
  }
  func.func @transform_2(%arg0: i32) -> (i32, i32) {
    %c0_i32 = arith.constant 0 : i32
    %c0_i32_0 = arith.constant 0 : i32
    %c0_i32_1 = arith.constant 0 : i32
    return %c0_i32, %c0_i32_0 : i32, i32
  }
  func.func @transform_3(%arg0: i32) -> (i32, i32) {
    %c0_i32 = arith.constant 0 : i32
    %c0_i32_0 = arith.constant 0 : i32
    %c0_i32_1 = arith.constant 0 : i32
    return %c0_i32, %c0_i32_0 : i32, i32
  }
  func.func @transform_4(%arg0: i32) -> (i32, i32) {
    %c0_i32 = arith.constant 0 : i32
    %c0_i32_0 = arith.constant 0 : i32
    %c0_i32_1 = arith.constant 0 : i32
    return %c0_i32, %c0_i32_0 : i32, i32
  }
  func.func @transform_5(%arg0: i32) -> (i32, i32) {
    %c0_i32 = arith.constant 0 : i32
    %c0_i32_0 = arith.constant 0 : i32
    %c0_i32_1 = arith.constant 0 : i32
    return %c0_i32, %c0_i32_0 : i32, i32
  }
  func.func @transform_6(%arg0: i32) -> (i32, i32) {
    %c0_i32 = arith.constant 0 : i32
    %c0_i32_0 = arith.constant 0 : i32
    %c0_i32_1 = arith.constant 0 : i32
    return %c0_i32, %c0_i32_0 : i32, i32
  }
  func.func @transform_7(%arg0: i32) -> (i32, i32) {
    %c0_i32 = arith.constant 0 : i32
    %c0_i32_0 = arith.constant 0 : i32
    %c0_i32_1 = arith.constant 0 : i32
    return %c0_i32, %c0_i32_0 : i32, i32
  }
  func.func @transform_8(%arg0: i32) -> (i32, i32, i32) {
    %c0_i32 = arith.constant 0 : i32
    %c0_i32_0 = arith.constant 0 : i32
    %c0_i32_1 = arith.constant 0 : i32
    return %arg0, %c0_i32, %c0_i32_0 : i32, i32, i32
  }
}

module attributes {stable_mosaic.version = 11 : i64} {
  func.func @_ffn_block_kernel(%arg0: i32, %arg1: memref<16x32xf32, #tpu.memory_space<vmem>>, %arg2: memref<32x64xbf16, #tpu.memory_space<vmem>>, %arg3: memref<1x64xf32, #tpu.memory_space<vmem>>, %arg4: memref<64x32xbf16, #tpu.memory_space<vmem>>, %arg5: memref<1x32xf32, #tpu.memory_space<vmem>>, %arg6: memref<1x32xf32, #tpu.memory_space<vmem>>, %arg7: memref<1x32xf32, #tpu.memory_space<vmem>>, %arg8: memref<16x32xf32, #tpu.memory_space<vmem>>) attributes {dimension_semantics = [#tpu.dimension_semantics<parallel>], iteration_bounds = array<i64: 1>, scalar_prefetch = 0 : i64, scratch_operands = 0 : i64, tpu.core_type = #tpu.core_type<tc>, window_params = [{transform_indices = @transform_0, window_bounds = array<i64: 16, 32>}, {pipeline_mode = #tpu.pipeline_mode<synchronous>, transform_indices = @transform_1, window_bounds = array<i64: 32, 64>}, {pipeline_mode = #tpu.pipeline_mode<synchronous>, transform_indices = @transform_2, window_bounds = array<i64: 1, 64>}, {pipeline_mode = #tpu.pipeline_mode<synchronous>, transform_indices = @transform_3, window_bounds = array<i64: 64, 32>}, {pipeline_mode = #tpu.pipeline_mode<synchronous>, transform_indices = @transform_4, window_bounds = array<i64: 1, 32>}, {pipeline_mode = #tpu.pipeline_mode<synchronous>, transform_indices = @transform_5, window_bounds = array<i64: 1, 32>}, {pipeline_mode = #tpu.pipeline_mode<synchronous>, transform_indices = @transform_6, window_bounds = array<i64: 1, 32>}, {transform_indices = @transform_7, window_bounds = array<i64: 16, 32>}]} {
    %c0 = arith.constant 0 : index
    %c0_0 = arith.constant 0 : index
    %0 = vector.load %arg1[%c0, %c0_0] : memref<16x32xf32, #tpu.memory_space<vmem>>, vector<16x32xf32>
    %1 = arith.truncf %0 : vector<16x32xf32> to vector<16x32xbf16>
    %c0_1 = arith.constant 0 : index
    %c0_2 = arith.constant 0 : index
    %2 = vector.load %arg2[%c0_1, %c0_2] : memref<32x64xbf16, #tpu.memory_space<vmem>>, vector<32x64xbf16>
    %cst = arith.constant dense<0.000000e+00> : vector<16x64xf32>
    %3 = tpu.matmul %1, %2, %cst {dimension_numbers = #tpu.dot_dimension_numbers<[1], [0], [0], [1], [0, 0, 1, 1], [], []>} : vector<16x32xbf16>, vector<32x64xbf16>, vector<16x64xf32> -> vector<16x64xf32>
    %c0_3 = arith.constant 0 : index
    %c0_4 = arith.constant 0 : index
    %4 = vector.load %arg3[%c0_3, %c0_4] : memref<1x64xf32, #tpu.memory_space<vmem>>, vector<1x64xf32>
    %5 = vector.broadcast %4 : vector<1x64xf32> to vector<16x64xf32>
    %6 = arith.addf %3, %5 : vector<16x64xf32>
    %cst_5 = arith.constant 5.000000e-01 : f32
    %7 = vector.broadcast %cst_5 : f32 to vector<16x64xf32>
    %8 = arith.mulf %7, %6 : vector<16x64xf32>
    %cst_6 = arith.constant 4.471500e-02 : f32
    %9 = vector.broadcast %cst_6 : f32 to vector<16x64xf32>
    %10 = arith.mulf %9, %6 : vector<16x64xf32>
    %11 = arith.mulf %10, %6 : vector<16x64xf32>
    %12 = arith.mulf %11, %6 : vector<16x64xf32>
    %13 = arith.addf %6, %12 : vector<16x64xf32>
    %cst_7 = arith.constant 0.797884583 : f32
    %14 = vector.broadcast %cst_7 : f32 to vector<16x64xf32>
    %15 = arith.mulf %14, %13 : vector<16x64xf32>
    %16 = math.tanh %15 : vector<16x64xf32>
    %cst_8 = arith.constant 1.000000e+00 : f32
    %17 = vector.broadcast %cst_8 : f32 to vector<16x64xf32>
    %18 = arith.addf %17, %16 : vector<16x64xf32>
    %19 = arith.mulf %8, %18 : vector<16x64xf32>
    %20 = arith.truncf %19 : vector<16x64xf32> to vector<16x64xbf16>
    %c0_9 = arith.constant 0 : index
    %c0_10 = arith.constant 0 : index
    %21 = vector.load %arg4[%c0_9, %c0_10] : memref<64x32xbf16, #tpu.memory_space<vmem>>, vector<64x32xbf16>
    %cst_11 = arith.constant dense<0.000000e+00> : vector<16x32xf32>
    %22 = tpu.matmul %20, %21, %cst_11 {dimension_numbers = #tpu.dot_dimension_numbers<[1], [0], [0], [1], [0, 0, 1, 1], [], []>} : vector<16x64xbf16>, vector<64x32xbf16>, vector<16x32xf32> -> vector<16x32xf32>
    %c0_12 = arith.constant 0 : index
    %c0_13 = arith.constant 0 : index
    %23 = vector.load %arg5[%c0_12, %c0_13] : memref<1x32xf32, #tpu.memory_space<vmem>>, vector<1x32xf32>
    %24 = vector.broadcast %23 : vector<1x32xf32> to vector<16x32xf32>
    %25 = arith.addf %22, %24 : vector<16x32xf32>
    %26 = arith.addf %25, %0 : vector<16x32xf32>
    %c0_14 = arith.constant 0 : index
    %c0_15 = arith.constant 0 : index
    %27 = vector.load %arg6[%c0_14, %c0_15] : memref<1x32xf32, #tpu.memory_space<vmem>>, vector<1x32xf32>
    %c0_16 = arith.constant 0 : index
    %c0_17 = arith.constant 0 : index
    %28 = vector.load %arg7[%c0_16, %c0_17] : memref<1x32xf32, #tpu.memory_space<vmem>>, vector<1x32xf32>
    %cst_18 = arith.constant dense<0.000000e+00> : vector<16xf32>
    %29 = vector.multi_reduction <add>, %26, %cst_18 [1] : vector<16x32xf32> to vector<16xf32>
    %30 = vector.shape_cast %29 : vector<16xf32> to vector<16x1xf32>
    %cst_19 = arith.constant 3.200000e+01 : f32
    %31 = vector.broadcast %cst_19 : f32 to vector<16x1xf32>
    %32 = arith.divf %30, %31 : vector<16x1xf32>
    %33 = vector.broadcast %32 : vector<16x1xf32> to vector<16x32xf32>
    %34 = arith.subf %26, %33 : vector<16x32xf32>
    %35 = arith.mulf %34, %34 : vector<16x32xf32>
    %cst_20 = arith.constant dense<0.000000e+00> : vector<16xf32>
    %36 = vector.multi_reduction <add>, %35, %cst_20 [1] : vector<16x32xf32> to vector<16xf32>
    %37 = vector.shape_cast %36 : vector<16xf32> to vector<16x1xf32>
    %cst_21 = arith.constant 3.200000e+01 : f32
    %38 = vector.broadcast %cst_21 : f32 to vector<16x1xf32>
    %39 = arith.divf %37, %38 : vector<16x1xf32>
    %cst_22 = arith.constant 9.99999996E-13 : f32
    %40 = vector.broadcast %cst_22 : f32 to vector<16x1xf32>
    %41 = arith.addf %39, %40 : vector<16x1xf32>
    %42 = math.rsqrt %41 : vector<16x1xf32>
    %43 = vector.broadcast %42 : vector<16x1xf32> to vector<16x32xf32>
    %44 = arith.mulf %34, %43 : vector<16x32xf32>
    %45 = vector.broadcast %27 : vector<1x32xf32> to vector<16x32xf32>
    %46 = arith.mulf %44, %45 : vector<16x32xf32>
    %47 = vector.broadcast %28 : vector<1x32xf32> to vector<16x32xf32>
    %48 = arith.addf %46, %47 : vector<16x32xf32>
    %c0_23 = arith.constant 0 : index
    %c0_24 = arith.constant 0 : index
    %49 = vector.load %arg8[%c0_23, %c0_24] : memref<16x32xf32, #tpu.memory_space<vmem>>, vector<16x32xf32>
    tpu.vector_store %arg8[%c0_23, %c0_24], %48 {strides = array<i32>} : memref<16x32xf32, #tpu.memory_space<vmem>>, vector<16x32xf32>,
    return
  }
  func.func @transform_0(%arg0: i32) -> (i32, i32) {
    %c0_i32 = arith.constant 0 : i32
    %c0_i32_0 = arith.constant 0 : i32
    return %arg0, %c0_i32 : i32, i32
  }
  func.func @transform_1(%arg0: i32) -> (i32, i32) {
    %c0_i32 = arith.constant 0 : i32
    %c0_i32_0 = arith.constant 0 : i32
    %c0_i32_1 = arith.constant 0 : i32
    return %c0_i32, %c0_i32_0 : i32, i32
  }
  func.func @transform_2(%arg0: i32) -> (i32, i32) {
    %c0_i32 = arith.constant 0 : i32
    %c0_i32_0 = arith.constant 0 : i32
    %c0_i32_1 = arith.constant 0 : i32
    return %c0_i32, %c0_i32_0 : i32, i32
  }
  func.func @transform_3(%arg0: i32) -> (i32, i32) {
    %c0_i32 = arith.constant 0 : i32
    %c0_i32_0 = arith.constant 0 : i32
    %c0_i32_1 = arith.constant 0 : i32
    return %c0_i32, %c0_i32_0 : i32, i32
  }
  func.func @transform_4(%arg0: i32) -> (i32, i32) {
    %c0_i32 = arith.constant 0 : i32
    %c0_i32_0 = arith.constant 0 : i32
    %c0_i32_1 = arith.constant 0 : i32
    return %c0_i32, %c0_i32_0 : i32, i32
  }
  func.func @transform_5(%arg0: i32) -> (i32, i32) {
    %c0_i32 = arith.constant 0 : i32
    %c0_i32_0 = arith.constant 0 : i32
    %c0_i32_1 = arith.constant 0 : i32
    return %c0_i32, %c0_i32_0 : i32, i32
  }
  func.func @transform_6(%arg0: i32) -> (i32, i32) {
    %c0_i32 = arith.constant 0 : i32
    %c0_i32_0 = arith.constant 0 : i32
    %c0_i32_1 = arith.constant 0 : i32
    return %c0_i32, %c0_i32_0 : i32, i32
  }
  func.func @transform_7(%arg0: i32) -> (i32, i32) {
    %c0_i32 = arith.constant 0 : i32
    %c0_i32_0 = arith.constant 0 : i32
    return %arg0, %c0_i32 : i32, i32
  }
}

module attributes {stable_mosaic.version = 11 : i64} {
  func.func @_ln_kernel(%arg0: i32, %arg1: memref<16x32xf32, #tpu.memory_space<vmem>>, %arg2: memref<1x32xf32, #tpu.memory_space<vmem>>, %arg3: memref<1x32xf32, #tpu.memory_space<vmem>>, %arg4: memref<16x32xf32, #tpu.memory_space<vmem>>) attributes {dimension_semantics = [#tpu.dimension_semantics<parallel>], iteration_bounds = array<i64: 1>, scalar_prefetch = 0 : i64, scratch_operands = 0 : i64, tpu.core_type = #tpu.core_type<tc>, window_params = [{transform_indices = @transform_0, window_bounds = array<i64: 16, 32>}, {pipeline_mode = #tpu.pipeline_mode<synchronous>, transform_indices = @transform_1, window_bounds = array<i64: 1, 32>}, {pipeline_mode = #tpu.pipeline_mode<synchronous>, transform_indices = @transform_2, window_bounds = array<i64: 1, 32>}, {transform_indices = @transform_3, window_bounds = array<i64: 16, 32>}]} {
    %c0 = arith.constant 0 : index
    %c0_0 = arith.constant 0 : index
    %0 = vector.load %arg1[%c0, %c0_0] : memref<16x32xf32, #tpu.memory_space<vmem>>, vector<16x32xf32>
    %c0_1 = arith.constant 0 : index
    %c0_2 = arith.constant 0 : index
    %1 = vector.load %arg2[%c0_1, %c0_2] : memref<1x32xf32, #tpu.memory_space<vmem>>, vector<1x32xf32>
    %c0_3 = arith.constant 0 : index
    %c0_4 = arith.constant 0 : index
    %2 = vector.load %arg3[%c0_3, %c0_4] : memref<1x32xf32, #tpu.memory_space<vmem>>, vector<1x32xf32>
    %cst = arith.constant dense<0.000000e+00> : vector<16xf32>
    %3 = vector.multi_reduction <add>, %0, %cst [1] : vector<16x32xf32> to vector<16xf32>
    %4 = vector.shape_cast %3 : vector<16xf32> to vector<16x1xf32>
    %cst_5 = arith.constant 3.200000e+01 : f32
    %5 = vector.broadcast %cst_5 : f32 to vector<16x1xf32>
    %6 = arith.divf %4, %5 : vector<16x1xf32>
    %7 = vector.broadcast %6 : vector<16x1xf32> to vector<16x32xf32>
    %8 = arith.subf %0, %7 : vector<16x32xf32>
    %9 = arith.mulf %8, %8 : vector<16x32xf32>
    %cst_6 = arith.constant dense<0.000000e+00> : vector<16xf32>
    %10 = vector.multi_reduction <add>, %9, %cst_6 [1] : vector<16x32xf32> to vector<16xf32>
    %11 = vector.shape_cast %10 : vector<16xf32> to vector<16x1xf32>
    %cst_7 = arith.constant 3.200000e+01 : f32
    %12 = vector.broadcast %cst_7 : f32 to vector<16x1xf32>
    %13 = arith.divf %11, %12 : vector<16x1xf32>
    %cst_8 = arith.constant 9.99999996E-13 : f32
    %14 = vector.broadcast %cst_8 : f32 to vector<16x1xf32>
    %15 = arith.addf %13, %14 : vector<16x1xf32>
    %16 = math.rsqrt %15 : vector<16x1xf32>
    %17 = vector.broadcast %16 : vector<16x1xf32> to vector<16x32xf32>
    %18 = arith.mulf %8, %17 : vector<16x32xf32>
    %19 = vector.broadcast %1 : vector<1x32xf32> to vector<16x32xf32>
    %20 = arith.mulf %18, %19 : vector<16x32xf32>
    %21 = vector.broadcast %2 : vector<1x32xf32> to vector<16x32xf32>
    %22 = arith.addf %20, %21 : vector<16x32xf32>
    %c0_9 = arith.constant 0 : index
    %c0_10 = arith.constant 0 : index
    %23 = vector.load %arg4[%c0_9, %c0_10] : memref<16x32xf32, #tpu.memory_space<vmem>>, vector<16x32xf32>
    tpu.vector_store %arg4[%c0_9, %c0_10], %22 {strides = array<i32>} : memref<16x32xf32, #tpu.memory_space<vmem>>, vector<16x32xf32>,
    return
  }
  func.func @transform_0(%arg0: i32) -> (i32, i32) {
    %c0_i32 = arith.constant 0 : i32
    %c0_i32_0 = arith.constant 0 : i32
    return %arg0, %c0_i32 : i32, i32
  }
  func.func @transform_1(%arg0: i32) -> (i32, i32) {
    %c0_i32 = arith.constant 0 : i32
    %c0_i32_0 = arith.constant 0 : i32
    %c0_i32_1 = arith.constant 0 : i32
    return %c0_i32, %c0_i32_0 : i32, i32
  }
  func.func @transform_2(%arg0: i32) -> (i32, i32) {
    %c0_i32 = arith.constant 0 : i32
    %c0_i32_0 = arith.constant 0 : i32
    %c0_i32_1 = arith.constant 0 : i32
    return %c0_i32, %c0_i32_0 : i32, i32
  }
  func.func @transform_3(%arg0: i32) -> (i32, i32) {
    %c0_i32 = arith.constant 0 : i32
    %c0_i32_0 = arith.constant 0 : i32
    return %arg0, %c0_i32 : i32, i32
  }
}

module attributes {stable_mosaic.version = 11 : i64} {
  func.func @_head_kernel(%arg0: i32, %arg1: memref<2x32xf32, #tpu.memory_space<vmem>>, %arg2: memref<2x32xf32, #tpu.memory_space<vmem>>, %arg3: memref<32x32xbf16, #tpu.memory_space<vmem>>, %arg4: memref<1x32xf32, #tpu.memory_space<vmem>>, %arg5: memref<32x1024xbf16, #tpu.memory_space<vmem>>, %arg6: memref<1x1024xf32, #tpu.memory_space<vmem>>, %arg7: memref<2x1024xf32, #tpu.memory_space<vmem>>) attributes {dimension_semantics = [#tpu.dimension_semantics<arbitrary>], iteration_bounds = array<i64: 1>, scalar_prefetch = 0 : i64, scratch_operands = 0 : i64, tpu.core_type = #tpu.core_type<tc>, window_params = [{pipeline_mode = #tpu.pipeline_mode<synchronous>, transform_indices = @transform_0, window_bounds = array<i64: 2, 32>}, {pipeline_mode = #tpu.pipeline_mode<synchronous>, transform_indices = @transform_1, window_bounds = array<i64: 2, 32>}, {pipeline_mode = #tpu.pipeline_mode<synchronous>, transform_indices = @transform_2, window_bounds = array<i64: 32, 32>}, {pipeline_mode = #tpu.pipeline_mode<synchronous>, transform_indices = @transform_3, window_bounds = array<i64: 1, 32>}, {pipeline_mode = #tpu.pipeline_mode<synchronous>, transform_indices = @transform_4, window_bounds = array<i64: 32, 1024>}, {pipeline_mode = #tpu.pipeline_mode<synchronous>, transform_indices = @transform_5, window_bounds = array<i64: 1, 1024>}, {pipeline_mode = #tpu.pipeline_mode<synchronous>, transform_indices = @transform_6, window_bounds = array<i64: 2, 1024>}]} {
    %c0 = arith.constant 0 : index
    %c0_0 = arith.constant 0 : index
    %0 = vector.load %arg1[%c0, %c0_0] : memref<2x32xf32, #tpu.memory_space<vmem>>, vector<2x32xf32>
    %1 = arith.truncf %0 : vector<2x32xf32> to vector<2x32xbf16>
    %c0_1 = arith.constant 0 : index
    %c0_2 = arith.constant 0 : index
    %2 = vector.load %arg3[%c0_1, %c0_2] : memref<32x32xbf16, #tpu.memory_space<vmem>>, vector<32x32xbf16>
    %cst = arith.constant dense<0.000000e+00> : vector<2x32xf32>
    %3 = tpu.matmul %1, %2, %cst {dimension_numbers = #tpu.dot_dimension_numbers<[1], [0], [0], [1], [0, 0, 1, 1], [], []>} : vector<2x32xbf16>, vector<32x32xbf16>, vector<2x32xf32> -> vector<2x32xf32>
    %c0_3 = arith.constant 0 : index
    %c0_4 = arith.constant 0 : index
    %4 = vector.load %arg4[%c0_3, %c0_4] : memref<1x32xf32, #tpu.memory_space<vmem>>, vector<1x32xf32>
    %5 = vector.broadcast %4 : vector<1x32xf32> to vector<2x32xf32>
    %6 = arith.addf %3, %5 : vector<2x32xf32>
    %7 = math.tanh %6 : vector<2x32xf32>
    %c0_5 = arith.constant 0 : index
    %c0_6 = arith.constant 0 : index
    %8 = vector.load %arg2[%c0_5, %c0_6] : memref<2x32xf32, #tpu.memory_space<vmem>>, vector<2x32xf32>
    %9 = arith.mulf %7, %8 : vector<2x32xf32>
    %10 = arith.truncf %9 : vector<2x32xf32> to vector<2x32xbf16>
    %c0_7 = arith.constant 0 : index
    %c0_8 = arith.constant 0 : index
    %11 = vector.load %arg5[%c0_7, %c0_8] : memref<32x1024xbf16, #tpu.memory_space<vmem>>, vector<32x1024xbf16>
    %cst_9 = arith.constant dense<0.000000e+00> : vector<2x1024xf32>
    %12 = tpu.matmul %10, %11, %cst_9 {dimension_numbers = #tpu.dot_dimension_numbers<[1], [0], [0], [1], [0, 0, 1, 1], [], []>} : vector<2x32xbf16>, vector<32x1024xbf16>, vector<2x1024xf32> -> vector<2x1024xf32>
    %c0_10 = arith.constant 0 : index
    %c0_11 = arith.constant 0 : index
    %13 = vector.load %arg6[%c0_10, %c0_11] : memref<1x1024xf32, #tpu.memory_space<vmem>>, vector<1x1024xf32>
    %14 = vector.broadcast %13 : vector<1x1024xf32> to vector<2x1024xf32>
    %15 = arith.addf %12, %14 : vector<2x1024xf32>
    %c0_12 = arith.constant 0 : index
    %c0_13 = arith.constant 0 : index
    %16 = vector.load %arg7[%c0_12, %c0_13] : memref<2x1024xf32, #tpu.memory_space<vmem>>, vector<2x1024xf32>
    tpu.vector_store %arg7[%c0_12, %c0_13], %15 {strides = array<i32>} : memref<2x1024xf32, #tpu.memory_space<vmem>>, vector<2x1024xf32>,
    return
  }
  func.func @transform_0(%arg0: i32) -> (i32, i32) {
    %c0_i32 = arith.constant 0 : i32
    %c0_i32_0 = arith.constant 0 : i32
    %c0_i32_1 = arith.constant 0 : i32
    return %c0_i32, %c0_i32_0 : i32, i32
  }
  func.func @transform_1(%arg0: i32) -> (i32, i32) {
    %c0_i32 = arith.constant 0 : i32
    %c0_i32_0 = arith.constant 0 : i32
    %c0_i32_1 = arith.constant 0 : i32
    return %c0_i32, %c0_i32_0 : i32, i32
  }
  func.func @transform_2(%arg0: i32) -> (i32, i32) {
    %c0_i32 = arith.constant 0 : i32
    %c0_i32_0 = arith.constant 0 : i32
    %c0_i32_1 = arith.constant 0 : i32
    return %c0_i32, %c0_i32_0 : i32, i32
  }
  func.func @transform_3(%arg0: i32) -> (i32, i32) {
    %c0_i32 = arith.constant 0 : i32
    %c0_i32_0 = arith.constant 0 : i32
    %c0_i32_1 = arith.constant 0 : i32
    return %c0_i32, %c0_i32_0 : i32, i32
  }
  func.func @transform_4(%arg0: i32) -> (i32, i32) {
    %c0_i32 = arith.constant 0 : i32
    %c0_i32_0 = arith.constant 0 : i32
    %c0_i32_1 = arith.constant 0 : i32
    return %c0_i32, %c0_i32_0 : i32, i32
  }
  func.func @transform_5(%arg0: i32) -> (i32, i32) {
    %c0_i32 = arith.constant 0 : i32
    %c0_i32_0 = arith.constant 0 : i32
    %c0_i32_1 = arith.constant 0 : i32
    return %c0_i32, %c0_i32_0 : i32, i32
  }
  func.func @transform_6(%arg0: i32) -> (i32, i32) {
    %c0_i32 = arith.constant 0 : i32
    %c0_i32_0 = arith.constant 0 : i32
    %c0_i32_1 = arith.constant 0 : i32
    return %c0_i32, %c0_i32_0 : i32, i32
  }
}

</mosaic_0001>

<bundles_post_ra>
// kernel: bert_class_forward.6
= control target key start
LH: loop header
LB: loop body
LE: loop exit
PB: predicated region body
PF: predicated region fallthrough
CT: control target
= control target key end

     0   :  { %vm18_vm0 = vcmask 261120   ;;  %v95_v4 = vmov 32.0   ;;  %s140_s0 = inlined_call_operand.vmem [shape: f32[16,32], index: 0, kind: input, shape index: {}]   ;;  %s141_s1 = inlined_call_operand.vmem [shape: f32[1,32], index: 1, kind: input, shape index: {}]   ;;  %s142_s2 = inlined_call_operand.vmem [shape: f32[1,32], index: 2, kind: input, shape index: {}]   ;;  %s143_s3 = inlined_call_operand.vmem [shape: f32[16,32], index: 3, kind: output, shape index: {}]  }
   0x1   :  { %v14_v0 = vld [vmem:[%s140_s0] sm:$0xff]  ;;  %v15_v2 = vld [vmem:[%s140_s0 + $0x8] sm:$0xff]  ;;  %89 = vrcp.f32 %v95_v4 }
   0x2   :  { %v19_v1 = vsel %vm18_vm0, %v14_v0, 0.0  ;;  %v22_v3 = vsel %vm18_vm0, %v15_v2, 0.0  ;;  %v87_v35 = vld [vmem:[%s141_s1] ss:$0 sm:$0xff] }
   0x3   :  { %20 = vadd.xlane.f32.xlu0 %v19_v1  ;;  %v88_v38 = vld [vmem:[%s142_s2] ss:$0 sm:$0xff] }
   0x7   :  { %v90_v5 = vpop.eup %89 }
   0x8   :  { %v26_v6 = vmul.f32 32.0, %v90_v5  ;;  %vm30_vm1 = vweird.f32 %v90_v5 }
   0xa   :  { %v27_v7 = vsub.f32 1.0, %v26_v6 }
   0xb   :  { %23 = vadd.xlane.f32.xlu0 %v22_v3 }
   0xc   :  { %v28_v8 = vmul.f32 %v90_v5, %v27_v7 }
   0xe   :  { %v29_v9 = vadd.f32 %v90_v5, %v28_v8 }
  0x10   :  { %v31_v10 = vsel %vm30_vm1, %v90_v5, %v29_v9 }
  0x76   :  { %v21_v11 = vpop.xlane.xlu0 %20 }
  0x77   :  { %v32_v12 = vmul.f32 %v31_v10, %v21_v11 }
  0x79   :  { %v34_v13 = vsub.f32 %v14_v0, %v32_v12 }
  0x7b   :  { %v36_v14 = vmul.f32 %v34_v13, %v34_v13 }
  0x7d   :  { %v38_v15 = vsel %vm18_vm0, %v36_v14, 0.0 }
  0x7e   :  { %39 = vadd.xlane.f32.xlu1 %v38_v15  ;;  %v24_v16 = vpop.xlane.xlu0 %23 }
  0x7f   :  { %v33_v17 = vmul.f32 %v31_v10, %v24_v16 }
  0x81   :  { %v35_v18 = vsub.f32 %v15_v2, %v33_v17 }
  0x83   :  { %v37_v19 = vmul.f32 %v35_v18, %v35_v18 }
  0x85   :  { %v41_v20 = vsel %vm18_vm0, %v37_v19, 0.0 }
  0x86   :  { %42 = vadd.xlane.f32.xlu1 %v41_v20 }
  0xf1   :  { %v40_v21 = vpop.xlane.xlu1 %39 }
  0xf2   :  { %v44_v22 = vmul.f32 %v40_v21, %v31_v10 }
  0xf4   :  { %v46_v23 = vadd.f32 1e-12, %v44_v22 }
  0xf6   :  { %91 = vrsqrt.f32 %v46_v23  ;;  %vm54_vm3 = vweird.f32 %v46_v23 }
  0xf9   :  { %v43_v24 = vpop.xlane.xlu1 %42 }
  0xfa   :  { %v45_v25 = vmul.f32 %v43_v24, %v31_v10 }
  0xfc   :  { %v92_v26 = vpop.eup %91  ;;  %v47_v27 = vadd.f32 1e-12, %v45_v25 }
  0xfd   :  { %v49_v28 = vmul.f32 %v92_v26, %v46_v23  ;;  %vm55_vm2 = vweird.f32 %v92_v26 }
  0xfe   :  { %93 = vrsqrt.f32 %v47_v27  ;;  %vm56_vm4 = vmor %vm54_vm3, %vm55_vm2  ;;  %vm64_vm6 = vweird.f32 %v47_v27 }
  0xff   :  { %v50_v29 = vmul.f32 %v92_v26, %v49_v28 }
 0x101   :  { %v51_v30 = vmul.f32 0.5, %v50_v29 }
 0x103   :  { %v52_v31 = vsub.f32 1.5, %v51_v30 }
 0x104   :  { %v94_v32 = vpop.eup %93 }
 0x105   :  { %v53_v33 = vmul.f32 %v92_v26, %v52_v31  ;;  %v59_v34 = vmul.f32 %v94_v32, %v47_v27  ;;  %vm65_vm5 = vweird.f32 %v94_v32 }
 0x106   :  { %vm66_vm7 = vmor %vm64_vm6, %vm65_vm5 }
 0x107   :  { %v57_v36 = vsel %vm56_vm4, %v92_v26, %v53_v33  ;;  %v60_v37 = vmul.f32 %v94_v32, %v59_v34 }
 0x108   :  { %v68_v39 = vmul.f32 %v57_v36, %v34_v13 }
 0x109   :  { %v61_v40 = vmul.f32 0.5, %v60_v37 }
 0x10a   :  { %v73_v41 = vmul.f32 %v87_v35, %v68_v39 }
 0x10b   :  { %v62_v42 = vsub.f32 1.5, %v61_v40 }
 0x10c   :  { %v78_v43 = vadd.f32 %v88_v38, %v73_v41 }
 0x10d   :  { %v63_v44 = vmul.f32 %v94_v32, %v62_v42 }
 0x10e   :  { %80 = vst.msk [vmem:[%s143_s3] sm:$0xff] %vm18_vm0, %v78_v43 }
 0x10f   :  { %v67_v45 = vsel %vm66_vm7, %v94_v32, %v63_v44 }
 0x110   :  { %v69_v46 = vmul.f32 %v67_v45, %v35_v18 }
 0x112   :  { %v74_v47 = vmul.f32 %v87_v35, %v69_v46 }
 0x114   :  { %v79_v48 = vadd.f32 %v88_v38, %v74_v47 }
 0x116   :  { %81 = vst.msk [vmem:[%s143_s3 + $0x8] sm:$0xff] %vm18_vm0, %v79_v48 }

// kernel: bert_class_forward.8
= control target key start
LH: loop header
LB: loop body
LE: loop exit
PB: predicated region body
PF: predicated region fallthrough
CT: control target
= control target key end

     0   :  { %vm50_vm0 = vcmask 261120   ;;  %vm123_vm1 = vcmask 523264   ;;  %v259_v42 = vmov 32.0   ;;  %s349_s1 = inlined_call_operand.vmem [shape: bf16[32,64], index: 1, kind: input, shape index: {}]   ;;  %s350_s0 = inlined_call_operand.vmem [shape: f32[16,32], index: 0, kind: input, shape index: {}]   ;;  %s351_s2 = inlined_call_operand.vmem [shape: f32[1,64], index: 2, kind: input, shape index: {}]   ;;  %s352_s4 = inlined_call_operand.vmem [shape: f32[1,32], index: 4, kind: input, shape index: {}]   ;;  %s353_s3 = inlined_call_operand.vmem [shape: bf16[64,32], index: 3, kind: input, shape index: {}]   ;;  %s354_s5 = inlined_call_operand.vmem [shape: f32[1,32], index: 5, kind: input, shape index: {}]   ;;  %s355_s6 = inlined_call_operand.vmem [shape: f32[1,32], index: 6, kind: input, shape index: {}]   ;;  %s356_s7 = inlined_call_operand.vmem [shape: f32[16,32], index: 7, kind: output, shape index: {}]  }
   0x1   :  { %v239_v0 = vld [vmem:[%s349_s1 + $0x8] sm:$0xff]  ;;  %v238_v1 = vld [vmem:[%s349_s1] sm:$0xff]  ;;  %v243_v5 = vld [vmem:[%s353_s3 + $0x18] sm:$0xff] }
   0x2   :  { %60 = vmatpush.bf16.msra.mxu0 %v239_v0  ;;  %v27_v2 = vld [vmem:[%s350_s0] sm:$0xff]  ;;  %v28_v3 = vld [vmem:[%s350_s0 + $0x8] sm:$0xff]  ;;  %131 = vmatpush.bf16.msra.mxu1 %v243_v5  ;;  %v242_v6 = vld [vmem:[%s353_s3 + $0x10] sm:$0xff] }
   0x3   :  { %v29_v4 = vpack.c.bf16 %v28_v3, %v27_v2  ;;  %v241_v7 = vld [vmem:[%s353_s3 + $0x8] sm:$0xff]  ;;  %v240_v8 = vld [vmem:[%s353_s3] sm:$0xff] }
   0x4   :  { %v245_v9 = vld [vmem:[%s351_s2] ss:$0 sm:$0xff] }
   0x5   :  { %v246_v33 = vld [vmem:[%s352_s4] ss:$0 sm:$0xff] }
   0x6   :  { %61 = vmatpush.bf16.msra.mxu0 %v238_v1  ;;  %132 = vmatpush.bf16.msra.mxu1 %v242_v6 }
   0x9   :  { %220 = vmatmul.msk.bf16.vlgmr.msra.gmra.mxu0 %vm50_vm0, %v29_v4 }
   0xa   :  { %133 = vmatpush.bf16.msra.mxu1 %v241_v7 }
   0xe   :  { %134 = vmatpush.bf16.msra.mxu1 %v240_v8 }
  0x86   :  { %v63_v10 = vpop.f32.mrf.mxu0 }
  0x87   :  { %v64_v11 = vadd.f32 %v245_v9, %v63_v10 }
  0x89   :  { %v70_v12 = vmul.f32 0.044715, %v64_v11  ;;  %v68_v27 = vmul.f32 0.5, %v64_v11 }
  0x8b   :  { %v72_v13 = vmul.f32 %v70_v12, %v64_v11  ;;  %v248_v12 = vld [vmem:[%s355_s6] ss:$0 sm:$0xff] }
  0x8d   :  { %v74_v14 = vmul.f32 %v72_v13, %v64_v11 }
  0x8e   :  { %v65_v15 = vpop.f32.mrf.mxu0 }
  0x8f   :  { %v66_v16 = vadd.f32 %v245_v9, %v65_v15  ;;  %v76_v17 = vadd.f32 %v74_v14, %v64_v11  ;;  %v247_v9 = vld [vmem:[%s354_s5] ss:$0 sm:$0xff] }
  0x91   :  { %v71_v18 = vmul.f32 0.044715, %v66_v16  ;;  %v78_v20 = vmul.f32 0.7978846, %v76_v17  ;;  %v69_v28 = vmul.f32 0.5, %v66_v16 }
  0x93   :  { %v73_v19 = vmul.f32 %v71_v18, %v66_v16  ;;  %249 = vtanh.f32 %v78_v20 }
  0x95   :  { %v75_v21 = vmul.f32 %v73_v19, %v66_v16 }
  0x97   :  { %v77_v22 = vadd.f32 %v75_v21, %v66_v16 }
  0x99   :  { %v79_v23 = vmul.f32 0.7978846, %v77_v22  ;;  %v250_v24 = vpop.eup %249 }
  0x9a   :  { %v82_v25 = vadd.f32 1.0, %v250_v24 }
  0x9b   :  { %251 = vtanh.f32 %v79_v23 }
  0x9c   :  { %v84_v30 = vmul.f32 %v82_v25, %v68_v27  ;;  %253 = vrcp.f32 %v259_v42 }
  0xa1   :  { %v252_v26 = vpop.eup %251 }
  0xa2   :  { %v83_v29 = vadd.f32 1.0, %v252_v26  ;;  %v254_v43 = vpop.eup %253 }
  0xa3   :  { %v152_v44 = vmul.f32 32.0, %v254_v43  ;;  %vm156_vm2 = vweird.f32 %v254_v43 }
  0xa4   :  { %v85_v31 = vmul.f32 %v83_v29, %v69_v28 }
  0xa5   :  { %v153_v45 = vsub.f32 1.0, %v152_v44 }
  0xa6   :  { %v86_v32 = vpack.c.bf16 %v85_v31, %v84_v30 }
  0xa7   :  { %v154_v46 = vmul.f32 %v254_v43, %v153_v45 }
  0xa8   :  { %237 = vmatmul.msk.bf16.vlgmr.msra.gmra.mxu1 %vm123_vm1, %v86_v32 }
  0xa9   :  { %v155_v47 = vadd.f32 %v254_v43, %v154_v46 }
  0xab   :  { %v157_v48 = vsel %vm156_vm2, %v254_v43, %v155_v47 }
 0x125   :  { %v136_v34 = vpop.f32.mrf.mxu1 }
 0x126   :  { %v137_v35 = vadd.f32 %v246_v33, %v136_v34 }
 0x128   :  { %v141_v36 = vadd.f32 %v137_v35, %v27_v2 }
 0x12a   :  { %v145_v37 = vsel %vm50_vm0, %v141_v36, 0.0 }
 0x12b   :  { %146 = vadd.xlane.f32.xlu0 %v145_v37 }
 0x12d   :  { %v138_v38 = vpop.f32.mrf.mxu1 }
 0x12e   :  { %v139_v39 = vadd.f32 %v246_v33, %v138_v38 }
 0x130   :  { %v142_v40 = vadd.f32 %v139_v39, %v28_v3 }
 0x132   :  { %v148_v41 = vsel %vm50_vm0, %v142_v40, 0.0 }
 0x133   :  { %149 = vadd.xlane.f32.xlu0 %v148_v41 }
 0x19e   :  { %v147_v49 = vpop.xlane.xlu0 %146 }
 0x19f   :  { %v158_v50 = vmul.f32 %v157_v48, %v147_v49 }
 0x1a1   :  { %v160_v51 = vsub.f32 %v141_v36, %v158_v50 }
 0x1a3   :  { %v162_v52 = vmul.f32 %v160_v51, %v160_v51 }
 0x1a5   :  { %v164_v53 = vsel %vm50_vm0, %v162_v52, 0.0 }
 0x1a6   :  { %165 = vadd.xlane.f32.xlu1 %v164_v53  ;;  %v150_v54 = vpop.xlane.xlu0 %149 }
 0x1a7   :  { %v159_v55 = vmul.f32 %v157_v48, %v150_v54 }
 0x1a9   :  { %v161_v56 = vsub.f32 %v142_v40, %v159_v55 }
 0x1ab   :  { %v163_v57 = vmul.f32 %v161_v56, %v161_v56 }
 0x1ad   :  { %v167_v58 = vsel %vm50_vm0, %v163_v57, 0.0 }
 0x1ae   :  { %168 = vadd.xlane.f32.xlu1 %v167_v58 }
 0x219   :  { %v166_v59 = vpop.xlane.xlu1 %165 }
 0x21a   :  { %v170_v60 = vmul.f32 %v166_v59, %v157_v48 }
 0x21c   :  { %v172_v61 = vadd.f32 1e-12, %v170_v60 }
 0x21e   :  { %255 = vrsqrt.f32 %v172_v61  ;;  %vm180_vm4 = vweird.f32 %v172_v61 }
 0x221   :  { %v169_v62 = vpop.xlane.xlu1 %168 }
 0x222   :  { %v171_v63 = vmul.f32 %v169_v62, %v157_v48 }
 0x224   :  { %v256_v0 = vpop.eup %255  ;;  %v173_v1 = vadd.f32 1e-12, %v171_v63 }
 0x225   :  { %v175_v2 = vmul.f32 %v256_v0, %v172_v61  ;;  %vm181_vm3 = vweird.f32 %v256_v0 }
 0x226   :  { %257 = vrsqrt.f32 %v173_v1  ;;  %vm182_vm5 = vmor %vm180_vm4, %vm181_vm3  ;;  %vm190_vm7 = vweird.f32 %v173_v1 }
 0x227   :  { %v176_v3 = vmul.f32 %v256_v0, %v175_v2 }
 0x229   :  { %v177_v4 = vmul.f32 0.5, %v176_v3 }
 0x22b   :  { %v178_v5 = vsub.f32 1.5, %v177_v4 }
 0x22c   :  { %v258_v6 = vpop.eup %257 }
 0x22d   :  { %v179_v7 = vmul.f32 %v256_v0, %v178_v5  ;;  %v185_v8 = vmul.f32 %v258_v6, %v173_v1  ;;  %vm191_vm6 = vweird.f32 %v258_v6 }
 0x22e   :  { %vm192_vm8 = vmor %vm190_vm7, %vm191_vm6 }
 0x22f   :  { %v183_v10 = vsel %vm182_vm5, %v256_v0, %v179_v7  ;;  %v186_v11 = vmul.f32 %v258_v6, %v185_v8 }
 0x230   :  { %v194_v13 = vmul.f32 %v183_v10, %v160_v51 }
 0x231   :  { %v187_v14 = vmul.f32 0.5, %v186_v11 }
 0x232   :  { %v199_v15 = vmul.f32 %v247_v9, %v194_v13 }
 0x233   :  { %v188_v16 = vsub.f32 1.5, %v187_v14 }
 0x234   :  { %v204_v17 = vadd.f32 %v248_v12, %v199_v15 }
 0x235   :  { %v189_v18 = vmul.f32 %v258_v6, %v188_v16 }
 0x236   :  { %206 = vst.msk [vmem:[%s356_s7] sm:$0xff] %vm50_vm0, %v204_v17 }
 0x237   :  { %v193_v19 = vsel %vm192_vm8, %v258_v6, %v189_v18 }
 0x238   :  { %v195_v20 = vmul.f32 %v193_v19, %v161_v56 }
 0x23a   :  { %v200_v21 = vmul.f32 %v247_v9, %v195_v20 }
 0x23c   :  { %v205_v22 = vadd.f32 %v248_v12, %v200_v21 }
 0x23e   :  { %207 = vst.msk [vmem:[%s356_s7 + $0x8] sm:$0xff] %vm50_vm0, %v205_v22 }

// kernel: bert_class_forward.11
= control target key start
LH: loop header
LB: loop body
LE: loop exit
PB: predicated region body
PF: predicated region fallthrough
CT: control target
= control target key end

     0   :  { %s629_s0 = inlined_call_operand.vmem [shape: f32[2,32], index: 0, kind: input, shape index: {}]   ;;  %s630_s1 = inlined_call_operand.vmem [shape: f32[2,32], index: 1, kind: input, shape index: {}]   ;;  %s631_s2 = inlined_call_operand.vmem [shape: bf16[32,32], index: 2, kind: input, shape index: {}]   ;;  %s632_s3 = inlined_call_operand.vmem [shape: f32[1,32], index: 3, kind: input, shape index: {}]   ;;  %s633_s4 = inlined_call_operand.vmem [shape: bf16[32,1024], index: 4, kind: input, shape index: {}]   ;;  %s634_s5 = inlined_call_operand.vmem [shape: f32[1,1024], index: 5, kind: input, shape index: {}]   ;;  %s635_s6 = inlined_call_operand.hbm [shape: f32[2,1024], index: 6, kind: output, shape index: {}]  }
   0x1   :  { %v414_v0 = vld [vmem:[%s631_s2 + $0x8] sm:$0xff] }
   0x2   :  { %11 = vsyncpa [#allocation3], 0  ;;  %57 = vmatpush.bf16.msra.mxu0 %v414_v0  ;;  %v413_v1 = vld [vmem:[%s631_s2] sm:$0xff]  ;;  %vm47_vm0 = vcmask 261120   ;;  %v424_v4 = vld [vmem:[%s633_s4 + $0x4c] sm:$0xf] }
   0x3   :  { %v25_v2 = vld [vmem:[%s629_s0] sm:$0x3]  ;;  %v385_v5 = vld [vmem:[%s633_s4 + $0x68] sm:$0xf0]  ;;  %v423_v9 = vld [vmem:[%s633_s4 + $0x44] sm:$0xf] }
   0x4   :  { %v26_v3 = vpack.c.bf16 %v25_v2, %v25_v2  ;;  %v375_v6 = vld [vmem:[%s633_s4 + $0x40] sm:$0xf]  ;;  %v388_v7 = vor.u32 %v424_v4, %v385_v5  ;;  %v377_v10 = vld [vmem:[%s633_s4 + $0x60] sm:$0xf0]  ;;  %v383_v13 = vld [vmem:[%s633_s4 + $0x48] sm:$0xf] }
   0x5   :  { %v427_v8 = vld [vmem:[%s633_s4 + $0x5c] sm:$0xf0]  ;;  %v380_v12 = vor.u32 %v423_v9, %v377_v10  ;;  %v428_v14 = vld [vmem:[%s633_s4 + $0x64] sm:$0xf0]  ;;  %v415_v18 = vld [vmem:[%s633_s4 + $0x4] sm:$0xf] }
   0x6   :  { %58 = vmatpush.bf16.msra.mxu0 %v413_v1  ;;  %v376_v11 = vor.u32 %v427_v8, %v375_v6  ;;  %v384_v15 = vor.u32 %v428_v14, %v383_v13  ;;  %v343_v16 = vld [vmem:[%s633_s4] sm:$0xf]  ;;  %v345_v20 = vld [vmem:[%s633_s4 + $0x20] sm:$0xf0]  ;;  %v351_v21 = vld [vmem:[%s633_s4 + $0x8] sm:$0xf] }
   0x7   :  { %204 = vmatpush.bf16.msra.mxu2 %v380_v12  ;;  %v419_v17 = vld [vmem:[%s633_s4 + $0x1c] sm:$0xf0]  ;;  %v420_v22 = vld [vmem:[%s633_s4 + $0x24] sm:$0xf0]  ;;  %v348_v23 = vor.u32 %v415_v18, %v345_v20  ;;  %v416_v25 = vld [vmem:[%s633_s4 + $0xc] sm:$0xf] }
   0x8   :  { %191 = vmatpush.bf16.msra.mxu1 %v376_v11  ;;  %217 = vmatpush.bf16.msra.mxu3 %v384_v15  ;;  %v344_v19 = vor.u32 %v419_v17, %v343_v16  ;;  %v352_v24 = vor.u32 %v420_v22, %v351_v21  ;;  %v353_v26 = vld [vmem:[%s633_s4 + $0x28] sm:$0xf0]  ;;  %v425_v28 = vld [vmem:[%s633_s4 + $0x54] sm:$0xf]  ;;  %v399_v30 = vld [vmem:[%s633_s4 + $0x58] sm:$0xf] }
   0x9   :  { %340 = vmatmul.msk.bf16.vlgmr.msra.gmra.mxu0 %vm47_vm0, %v26_v3  ;;  %v356_v27 = vor.u32 %v416_v25, %v353_v26  ;;  %v393_v29 = vld [vmem:[%s633_s4 + $0x70] sm:$0xf0]  ;;  %v430_v32 = vld [vmem:[%s633_s4 + $0x74] sm:$0xf0]  ;;  %v391_v33 = vld [vmem:[%s633_s4 + $0x50] sm:$0xf] }
   0xa   :  { %230 = vmatpush.bf16.msrb.mxu0 %v388_v7  ;;  %v396_v31 = vor.u32 %v425_v28, %v393_v29  ;;  %v429_v34 = vld [vmem:[%s633_s4 + $0x6c] sm:$0xf0]  ;;  %v400_v35 = vor.u32 %v430_v32, %v399_v30  ;;  %v426_v37 = vld [vmem:[%s633_s4 + $0x5c] sm:$0xf]  ;;  %v417_v39 = vld [vmem:[%s633_s4 + $0x14] sm:$0xf] }
   0xb   :  { %205 = vmatpush.bf16.msra.mxu2 %v348_v23  ;;  %v392_v36 = vor.u32 %v429_v34, %v391_v33  ;;  %v401_v38 = vld [vmem:[%s633_s4 + $0x78] sm:$0xf0]  ;;  %v361_v41 = vld [vmem:[%s633_s4 + $0x30] sm:$0xf0]  ;;  %v367_v42 = vld [vmem:[%s633_s4 + $0x18] sm:$0xf] }
   0xc   :  { %192 = vmatpush.bf16.msra.mxu1 %v344_v19  ;;  %218 = vmatpush.bf16.msra.mxu3 %v352_v24  ;;  %v404_v40 = vor.u32 %v426_v37, %v401_v38  ;;  %v422_v43 = vld [vmem:[%s633_s4 + $0x34] sm:$0xf0]  ;;  %v364_v44 = vor.u32 %v417_v39, %v361_v41  ;;  %v359_v46 = vld [vmem:[%s633_s4 + $0x10] sm:$0xf]  ;;  %v418_v48 = vld [vmem:[%s633_s4 + $0x1c] sm:$0xf] }
   0xd   :  { %v368_v45 = vor.u32 %v422_v43, %v367_v42  ;;  %v421_v47 = vld [vmem:[%s633_s4 + $0x2c] sm:$0xf0]  ;;  %v369_v50 = vld [vmem:[%s633_s4 + $0x38] sm:$0xf0]  ;;  %v432_v52 = vld [vmem:[%s632_s3] ss:$0 sm:$0xff] }
   0xe   :  { %231 = vmatpush.bf16.msrb.mxu0 %v356_v27  ;;  %v360_v49 = vor.u32 %v421_v47, %v359_v46  ;;  %v372_v51 = vor.u32 %v418_v48, %v369_v50  ;;  %v65_v55 = vld [vmem:[%s630_s1] sm:$0x3]  ;;  %vm303_vm1 = vcmask 1041408   ;;  %vm305_vm2 = vcmask 1045508   ;;  %s461_s4 = smov [#allocation2]   ;;  %s323_s19 = sshll.u32 %s635_s6, 4  ;;  %s324_s19 = int_to_ptr.hbm [resolvable:$true] %s323_s19 }
   0xf   :  { %256 = vmatpush.bf16.msrb.mxu2 %v396_v31  ;;  %v84_v60 = vld [vmem:[%s634_s5] sm:$0xff]  ;;  %vm307_vm3 = vcmask 1043456   ;;  %s321_s5 = sshll.u32 %s461_s4, 4  ;;  %s322_s5 = int_to_ptr.vmem [resolvable:$true] %s321_s5 }
  0x10   :  { %269 = vmatpush.bf16.msrb.mxu3 %v400_v35  ;;  %243 = vmatpush.bf16.msrb.mxu1 %v392_v36  ;;  %v89_v63 = vperm.slane %v84_v60, 3  ;;  %v87_v0 = vperm.slane %v84_v60, 1  ;;  %v88_v1 = vperm.slane %v84_v60, 2  ;;  %v86_v2 = vperm.slane %v84_v60, 0 }
  0x11   :  { %v93_v21 = vperm.slane %v84_v60, 7  ;;  %v91_v22 = vperm.slane %v84_v60, 5  ;;  %v92_v23 = vperm.slane %v84_v60, 6  ;;  %v90_v24 = vperm.slane %v84_v60, 4 }
  0x12   :  { %282 = vmatpush.bf16.msra.mxu0 %v404_v40 }
  0x13   :  { %257 = vmatpush.bf16.msrb.mxu2 %v364_v44 }
  0x14   :  { %270 = vmatpush.bf16.msrb.mxu3 %v368_v45  ;;  %244 = vmatpush.bf16.msrb.mxu1 %v360_v49 }
  0x16   :  { %283 = vmatpush.bf16.msra.mxu0 %v372_v51 }
  0x86   :  { %v60_v53 = vpop.f32.mrf.mxu0 }
  0x87   :  { %v61_v54 = vadd.f32 %v432_v52, %v60_v53 }
  0x89   :  { %433 = vtanh.f32 %v61_v54 }
  0x8e   :  { %v62_v56 = vpop.f32.mrf.mxu0 }
  0x8f   :  { %v434_v57 = vpop.eup %433 }
  0x90   :  { %v66_v58 = vmul.f32 %v434_v57, %v65_v55 }
  0x92   :  { %v67_v59 = vpack.c.bf16 %v66_v58, %v66_v58 }
  0x94   :  { %405 = vmatmul.msk.bf16.vlgmr.msra.gmra.mxu1 %vm47_vm0, %v67_v59  ;;  %406 = vmatmul.msk.bf16.vlgmr.msra.gmra.mxu2 %vm47_vm0, %v67_v59 }
  0x95   :  { %407 = vmatmul.msk.bf16.vlgmr.msra.gmra.mxu3 %vm47_vm0, %v67_v59  ;;  %408 = vmatmul.msk.bf16.vlgmr.msrb.gmra.mxu0 %vm47_vm0, %v67_v59 }
  0xa4   :  { %409 = vmatmul.msk.bf16.vlgmr.msrb.gmra.mxu1 %vm47_vm0, %v67_v59  ;;  %410 = vmatmul.msk.bf16.vlgmr.msrb.gmra.mxu2 %vm47_vm0, %v67_v59 }
  0xa5   :  { %411 = vmatmul.msk.bf16.vlgmr.msrb.gmra.mxu3 %vm47_vm0, %v67_v59  ;;  %412 = vmatmul.msk.bf16.vlgmr.msra.gmra.mxu0 %vm47_vm0, %v67_v59 }
 0x111   :  { %v194_v61 = vpop.f32.mrf.mxu1 }
 0x112   :  { %v233_v62 = vpop.f32.mrf.mxu0  ;;  %v195_v9 = vadd.f32 %v194_v61, %v86_v2 }
 0x113   :  { %v234_v3 = vadd.f32 %v233_v62, %v89_v63 }
 0x115   :  { %v299_v12 = vrot.slane %v234_v3, 2 }
 0x117   :  { %v207_v4 = vpop.f32.mrf.mxu2 }
 0x118   :  { %v208_v5 = vadd.f32 %v207_v4, %v87_v0  ;;  %v220_v6 = vpop.f32.mrf.mxu3 }
 0x119   :  { %v221_v7 = vadd.f32 %v220_v6, %v88_v1  ;;  %v196_v8 = vpop.f32.mrf.mxu1 }
 0x11a   :  { %v297_v10 = vrot.slane %v208_v5, 6  ;;  %v235_v11 = vpop.f32.mrf.mxu0 }
 0x11b   :  { %v298_v13 = vrot.slane %v221_v7, 4 }
 0x11c   :  { %v304_v14 = vsel %vm303_vm1, %v195_v9, %v297_v10 }
 0x11d   :  { %v306_v15 = vsel %vm305_vm2, %v298_v13, %v299_v12 }
 0x11e   :  { %v308_v16 = vsel %vm307_vm3, %v304_v14, %v306_v15 }
 0x11f   :  { %v209_v17 = vpop.f32.mrf.mxu2  ;;  %314 = vst [vmem:[#allocation2] sm:$0xff] %v308_v16 }
 0x120   :  { %v222_v18 = vpop.f32.mrf.mxu3 }
 0x121   :  { %v246_v19 = vpop.f32.mrf.mxu1 }
 0x122   :  { %v285_v20 = vpop.f32.mrf.mxu0  ;;  %v247_v31 = vadd.f32 %v246_v19, %v90_v24 }
 0x123   :  { %v286_v25 = vadd.f32 %v285_v20, %v93_v21 }
 0x125   :  { %v302_v34 = vrot.slane %v286_v25, 2 }
 0x127   :  { %v259_v26 = vpop.f32.mrf.mxu2 }
 0x128   :  { %v260_v27 = vadd.f32 %v259_v26, %v91_v22  ;;  %v272_v28 = vpop.f32.mrf.mxu3 }
 0x129   :  { %v273_v29 = vadd.f32 %v272_v28, %v92_v23  ;;  %v248_v30 = vpop.f32.mrf.mxu1 }
 0x12a   :  { %v300_v32 = vrot.slane %v260_v27, 6  ;;  %v287_v33 = vpop.f32.mrf.mxu0 }
 0x12b   :  { %v301_v35 = vrot.slane %v273_v29, 4 }
 0x12c   :  { %v309_v36 = vsel %vm303_vm1, %v247_v31, %v300_v32 }
 0x12d   :  { %v310_v37 = vsel %vm305_vm2, %v301_v35, %v302_v34 }
 0x12e   :  { %v311_v38 = vsel %vm307_vm3, %v309_v36, %v310_v37 }
 0x12f   :  { %v261_v39 = vpop.f32.mrf.mxu2  ;;  %315 = vst [vmem:[#allocation2 + $0x8] sm:$0xff] %v311_v38 }
 0x130   :  { %v274_v40 = vpop.f32.mrf.mxu3  ;;  %326 = dma.vmem_to_hbm [thread:$0]  %s322_s5, 256, %s324_s19, [#allocation3]  }
 0x131   :  { %459 = dma.done.wait [#allocation3], 256  }
 0x132   :  { %460 = vsyncadd [#allocation3], 4294967040 }
 0x133   :  { %331 = vsyncpa [#allocation3], 1 }

// kernel: bert_class_forward.7
= control target key start
LH: loop header
LB: loop body
LE: loop exit
PB: predicated region body
PF: predicated region fallthrough
CT: control target
= control target key end

     0   :  { %s995_s27 = smov 0   ;;  %s1106_s0 = inlined_call_operand.vmem [shape: f32[2,8,32], index: 0, kind: input, shape index: {}]   ;;  %s1107_s1 = inlined_call_operand.vmem [shape: f32[2,1,8], index: 1, kind: input, shape index: {}]   ;;  %s1108_s2 = inlined_call_operand.vmem [shape: bf16[32,96], index: 2, kind: input, shape index: {}]   ;;  %s1109_s3 = inlined_call_operand.vmem [shape: f32[1,96], index: 3, kind: input, shape index: {}]   ;;  %s1110_s4 = inlined_call_operand.vmem [shape: bf16[32,32], index: 4, kind: input, shape index: {}]   ;;  %s1111_s5 = inlined_call_operand.vmem [shape: f32[1,32], index: 5, kind: input, shape index: {}]   ;;  %s1112_s6 = inlined_call_operand.vmem [shape: f32[1,32], index: 6, kind: input, shape index: {}]   ;;  %s1113_s7 = inlined_call_operand.vmem [shape: f32[1,32], index: 7, kind: input, shape index: {}]   ;;  %s1114_s8 = inlined_call_operand.vmem [shape: f32[2,8,32], index: 8, kind: output, shape index: {}]  }
   0x1 LB: > { %s836_s28 = sadd.s32 4294967295, %s933_s27   ;;  %p840_p0 = scmp.ge.s32.totalorder %s933_s27, 1  ;;  %s933_s27 = sphi %s995_s27, %s18_s27  }
   0x2   : > { %p269_p1 = scmp.lt.s32.totalorder %s933_s27, 3 }
   0x4   : > { %p270_p2 = pnand %p840_p0, %p269_p1 }
   0x5   : > { %p304_p3 = scmp.lt.s32.totalorder (!%p270_p2), %s836_s28, 1  ;;  %s935_s20 = smov (!%p270_p2), 64  }
   0x6   : > { %273 = sbr.rel (%p270_p2) target bundleno = 1725 (0x6bd), region = 52  ;;  %s936_s21 = smov (!%p270_p2), 120  }
   0x7   : > { %s937_s22 = smov (!%p270_p2), 96   ;;  %s938_s23 = smov (!%p270_p2), 56  }
   0x8   : > { %s939_s24 = smov (!%p270_p2), 88   ;;  %s940_s29 = smov (!%p270_p2), 72  }
   0x9   : > { %s941_s30 = smov (!%p270_p2), 80   ;;  %s942_s9 = smov (!%p270_p2), 112  }
   0xa   : > { %s943_s10 = smov (!%p270_p2), 104   ;;  %s944_s12 = smov (!%p270_p2), 40  }
   0xb   : > { %v876_v0 = vld [vmem:[%s1108_s2 + $0x8] sm:$0xff]  ;;  %v875_v1 = vld [vmem:[%s1108_s2] sm:$0xff]  ;;  %s1116_s28 = smov (!%p304_p3, %s836_s28), 1  ;;  %vm339_vm0 = vcmask 261120   ;;  %vm359_vm1 = vcmask 64512   ;;  %s945_s13 = smov 8  }
   0xc   : > { %349 = vmatpush.bf16.msra.mxu0 %v876_v0  ;;  %s841_s11 = sshll.u32 %s1116_s28, 3  ;;  %s310_s14 = scalar_lea.vmem %s1107_s1, %s1116_s28  ;;  %v902_v4 = vld [vmem:[%s1109_s3] ss:$0 sm:$0xff] }
   0xd   : > { %s307_s17 = scalar_lea.vmem %s1106_s0, %s841_s11  ;;  %v1046_v13 = vld [vmem:[%s310_s14] ss:$0 sm:$0xff]  ;;  %s946_s14 = smov 48  }
   0xe   : > { %v1021_v2 = vld [vmem:[%s307_s17] sm:$0xff]  ;;  %s947_s15 = smov 16   ;;  %s948_s16 = smov 24  }
   0xf   : > { %v318_v3 = vpack.c.bf16 %v1021_v2, %v1021_v2 }
  0x10   : > { %350 = vmatpush.bf16.msra.mxu0 %v875_v1 }
  0x13   : > { %851 = vmatmul.msk.bf16.vlgmr.msra.gmra.mxu0 %vm339_vm0, %v318_v3 }
  0x90   : > { %v352_v5 = vpop.f32.mrf.mxu0 }
  0x91   : > { %v1029_v6 = vadd.f32 %v902_v4, %v352_v5 }
  0x93   : > { %413 = vrot.lane.b32.xlu2 %v1029_v6, %s935_s20  ;;  %439 = vrot.lane.b32.xlu1 %v1029_v6, %s936_s21 }
  0x94   : > { %357 = vrot.lane.b32.xlu0 %v1029_v6, %s937_s22 }
  0x98   : > { %v354_v7 = vpop.f32.mrf.mxu0 }
  0x9b   : > { %493 = vrot.lane.b32.xlu2 %v1029_v6, %s938_s23 }
  0x9c   : > { %441 = vrot.lane.b32.xlu0 %v1029_v6, %s939_s24 }
  0xed   : > { %v414_v8 = vpop.permute.xlu2 %413 }
  0xee   : > { %434 = vmatpush.msra.mxu2 %v414_v8 }
  0xf5   : > { %v494_v9 = vpop.permute.xlu2 %493 }
  0xf6   : > { %514 = vmatpush.msrb.mxu2 %v494_v9 }
 0x105   : > { %v440_v12 = vpop.permute.xlu1 %439 }
 0x106   : > { %v358_v10 = vpop.permute.xlu0 %357 }
 0x107   : > { %852 = vmatpush.xpose.msk.msra.mxu1 %vm359_vm1, %v358_v10 }
 0x10a   : > { %853 = vmatmul.msk.f32.vlgmr.msra.gmra.mxu1 %vm359_vm1, %v1029_v6 }
 0x10e   : > { %v442_v11 = vpop.permute.xlu0 %441 }
 0x10f   : > { %855 = vmatpush.xpose.msk.msrb.mxu0 %vm359_vm1, %v442_v11 }
 0x112   : > { %856 = vmatmul.msk.f32.vlgmr.msrb.gmra.mxu0 %vm359_vm1, %v440_v12 }
 0x187   : > { %v381_v14 = vpop.f32.mrf.mxu1 }
 0x188   : > { %v384_v15 = vmul.f32 0.35355338, %v381_v14 }
 0x18a   : > { %v388_v16 = vadd.f32 %v1046_v13, %v384_v15 }
 0x18c   : > { %v389_v17 = vsel %vm359_vm1, %v388_v16, -inf }
 0x18d   : > { %390 = vmax.xlane.f32.xlu1 %v389_v17 }
 0x18f   : > { %v464_v18 = vpop.f32.mrf.mxu0 }
 0x190   : > { %v467_v19 = vmul.f32 0.35355338, %v464_v18 }
 0x192   : > { %v468_v20 = vadd.f32 %v1046_v13, %v467_v19 }
 0x194   : > { %v469_v21 = vsel %vm359_vm1, %v468_v20, -inf }
 0x195   : > { %470 = vmax.xlane.f32.xlu2 %v469_v21 }
 0x1a6   : > { %601 = vrot.lane.b32.xlu1 %v1029_v6, %s940_s29 }
 0x1ad   : > { %521 = vrot.lane.b32.xlu2 %v1029_v6, %s941_s30 }
 0x200   : > { %v391_v22 = vpop.xlane.xlu1 %390 }
 0x201   : > { %v392_v23 = vsub.f32 %v388_v16, %v391_v22 }
 0x203   : > { %v393_v24 = vmul.f32 1.442695, %v392_v23 }
 0x205   : > { %907 = vpow2.f32 %v393_v24 }
 0x208   : > { %v471_v25 = vpop.xlane.xlu2 %470 }
 0x209   : > { %v472_v26 = vsub.f32 %v468_v20, %v471_v25 }
 0x20b   : > { %v908_v27 = vpop.eup %907  ;;  %v473_v28 = vmul.f32 1.442695, %v472_v26 }
 0x20c   : > { %v395_v29 = vsel %vm359_vm1, %v908_v27, 0.0 }
 0x20d   : > { %909 = vpow2.f32 %v473_v28  ;;  %396 = vadd.xlane.f32.xlu2 %v395_v29 }
 0x210   : > { %v522_v30 = vpop.permute.xlu2 %521 }
 0x211   : > { %858 = vmatpush.xpose.msk.msrb.mxu1 %vm359_vm1, %v522_v30 }
 0x213   : > { %v910_v31 = vpop.eup %909 }
 0x214   : > { %v475_v32 = vsel %vm359_vm1, %v910_v31, 0.0 }
 0x215   : > { %476 = vadd.xlane.f32.xlu0 %v475_v32 }
 0x218   : > { %v602_v51 = vpop.permute.xlu1 %601 }
 0x225   : > { %519 = vrot.lane.b32.xlu2 %v1029_v6, %s942_s9  ;;  %s314_s9 = scalar_lea.vmem %s1114_s8, %s841_s11 }
 0x229   : > { %599 = vrot.lane.b32.xlu0 %v1029_v6, %s943_s10 }
 0x280   : > { %v397_v33 = vpop.xlane.xlu2 %396 }
 0x281   : > { %911 = vrcp.f32 %v397_v33  ;;  %v409_v39 = vand.u32 2147483648, %v397_v33  ;;  %v407_v41 = vand.u32 2147483647, %v397_v33  ;;  %vm403_vm3 = vweird.f32 %v397_v33 }
 0x283   : > { %v410_v44 = vor.u32 1.1754944e-38, %v409_v39  ;;  %vm408_vm5 = vcmp.eq.f32.partialorder %v407_v41, 8.507059e+37 }
 0x287   : > { %v912_v34 = vpop.eup %911 }
 0x288   : > { %v399_v35 = vmul.f32 %v912_v34, %v397_v33  ;;  %v477_v36 = vpop.xlane.xlu0 %476  ;;  %v520_v37 = vpop.permute.xlu2 %519  ;;  %vm404_vm2 = vweird.f32 %v912_v34 }
 0x289   : > { %913 = vrcp.f32 %v477_v36  ;;  %859 = vmatmul.msk.f32.vlgmr.msrb.gmra.mxu1 %vm359_vm1, %v520_v37  ;;  %vm405_vm4 = vmor %vm403_vm3, %vm404_vm2  ;;  %v489_v50 = vand.u32 2147483648, %v477_v36  ;;  %v487_v53 = vand.u32 2147483647, %v477_v36  ;;  %vm483_vm7 = vweird.f32 %v477_v36 }
 0x28a   : > { %v400_v38 = vsub.f32 1.0, %v399_v35 }
 0x28b   : > { %v490_v55 = vor.u32 1.1754944e-38, %v489_v50  ;;  %vm488_vm9 = vcmp.eq.f32.partialorder %v487_v53, 8.507059e+37 }
 0x28c   : > { %v401_v40 = vmul.f32 %v912_v34, %v400_v38 }
 0x28e   : > { %v402_v42 = vadd.f32 %v912_v34, %v401_v40 }
 0x28f   : > { %v914_v43 = vpop.eup %913 }
 0x290   : > { %v479_v45 = vmul.f32 %v914_v43, %v477_v36  ;;  %v406_v46 = vsel %vm405_vm4, %v912_v34, %v402_v42  ;;  %vm484_vm6 = vweird.f32 %v914_v43  ;;  %vm692_vm4 = vcmask 130048  }
 0x291   : > { %v411_v47 = vsel %vm408_vm5, %v410_v44, %v406_v46  ;;  %vm485_vm8 = vmor %vm483_vm7, %vm484_vm6  ;;  %v877_v46 = vld [vmem:[%s1110_s4] sm:$0xff]  ;;  %vm694_vm5 = vcmask 195584  }
 0x292   : > { %v480_v48 = vsub.f32 1.0, %v479_v45  ;;  %v412_v49 = vmul.f32 %v908_v27, %v411_v47  ;;  %v878_v45 = vld [vmem:[%s1110_s4 + $0x8] sm:$0xff] }
 0x294   : > { %v481_v52 = vmul.f32 %v914_v43, %v480_v48  ;;  %854 = vmatmul.msk.f32.vlgmr.msra.gmra.mxu2 %vm359_vm1, %v412_v49 }
 0x295   : > { %861 = vmatpush.xpose.msk.msra.mxu2 %vm359_vm1, %v602_v51 }
 0x296   : > { %v482_v54 = vadd.f32 %v914_v43, %v481_v52 }
 0x298   : > { %v486_v56 = vsel %vm485_vm8, %v914_v43, %v482_v54  ;;  %v904_v54 = vld [vmem:[%s1111_s5] ss:$0 sm:$0xff] }
 0x299   : > { %v491_v57 = vsel %vm488_vm9, %v490_v55, %v486_v56 }
 0x29a   : > { %v492_v58 = vmul.f32 %v910_v31, %v491_v57 }
 0x29b   : > { %v600_v59 = vpop.permute.xlu0 %599 }
 0x29c   : > { %857 = vmatmul.msk.f32.vlgmr.msrb.gmra.mxu2 %vm359_vm1, %v492_v58 }
 0x2a4   : > { %862 = vmatmul.msk.f32.vlgmr.msra.gmra.mxu2 %vm359_vm1, %v600_v59 }
 0x306   : > { %v544_v60 = vpop.f32.mrf.mxu1 }
 0x307   : > { %v547_v61 = vmul.f32 0.35355338, %v544_v60  ;;  %v949_v60 = vmov 32.0  }
 0x309   : > { %v548_v62 = vadd.f32 %v1046_v13, %v547_v61 }
 0x30b   : > { %v549_v63 = vsel %vm359_vm1, %v548_v62, -inf }
 0x30c   : > { %550 = vmax.xlane.f32.xlu2 %v549_v63 }
 0x317   : > { %v1066_v0 = vpop.f32.mrf.mxu2 }
 0x31f   : > { %v516_v1 = vpop.f32.mrf.mxu2 }
 0x327   : > { %v624_v3 = vpop.f32.mrf.mxu2 }
 0x328   : > { %v627_v4 = vmul.f32 0.35355338, %v624_v3 }
 0x32a   : > { %v628_v5 = vadd.f32 %v1046_v13, %v627_v4 }
 0x32c   : > { %v629_v7 = vsel %vm359_vm1, %v628_v5, -inf }
 0x32d   : > { %630 = vmax.xlane.f32.xlu1 %v629_v7 }
 0x346   : > { %653 = vrot.lane.b32.xlu1 %v1029_v6, %s944_s12 }
 0x37f   : > { %v551_v8 = vpop.xlane.xlu2 %550 }
 0x380   : > { %v552_v9 = vsub.f32 %v548_v62, %v551_v8 }
 0x382   : > { %v553_v10 = vmul.f32 1.442695, %v552_v9 }
 0x384   : > { %915 = vpow2.f32 %v553_v10 }
 0x38a   : > { %v916_v11 = vpop.eup %915 }
 0x38b   : > { %v555_v12 = vsel %vm359_vm1, %v916_v11, 0.0 }
 0x38c   : > { %556 = vadd.xlane.f32.xlu0 %v555_v12 }
 0x3a0   : > { %v631_v14 = vpop.xlane.xlu1 %630  ;;  %680 = vrot.lane.b32.xlu0 %v516_v1, %s945_s13 }
 0x3a1   : > { %v632_v15 = vsub.f32 %v628_v5, %v631_v14 }
 0x3a3   : > { %v633_v16 = vmul.f32 1.442695, %v632_v15 }
 0x3a5   : > { %917 = vpow2.f32 %v633_v16 }
 0x3ab   : > { %v918_v13 = vpop.eup %917 }
 0x3ac   : > { %v635_v17 = vsel %vm359_vm1, %v918_v13, 0.0 }
 0x3ad   : > { %636 = vadd.xlane.f32.xlu2 %v635_v17 }
 0x3b8   : > { %v654_v18 = vpop.permute.xlu1 %653 }
 0x3b9   : > { %674 = vmatpush.msra.mxu1 %v654_v18  ;;  %v905_v18 = vld [vmem:[%s1112_s6] ss:$0 sm:$0xff] }
 0x3c5   : > { %573 = vrot.lane.b32.xlu2 %v1029_v6, %s946_s14 }
 0x3ff   : > { %v557_v19 = vpop.xlane.xlu0 %556 }
 0x400   : > { %919 = vrcp.f32 %v557_v19  ;;  %v569_v25 = vand.u32 2147483648, %v557_v19  ;;  %vm563_vm11 = vweird.f32 %v557_v19  ;;  %v567_v27 = vand.u32 2147483647, %v557_v19 }
 0x402   : > { %v570_v29 = vor.u32 1.1754944e-38, %v569_v25  ;;  %vm568_vm13 = vcmp.eq.f32.partialorder %v567_v27, 8.507059e+37 }
 0x406   : > { %v920_v20 = vpop.eup %919 }
 0x407   : > { %v559_v21 = vmul.f32 %v920_v20, %v557_v19  ;;  %vm564_vm10 = vweird.f32 %v920_v20 }
 0x408   : > { %vm565_vm12 = vmor %vm563_vm11, %vm564_vm10 }
 0x409   : > { %v560_v22 = vsub.f32 1.0, %v559_v21 }
 0x40b   : > { %v561_v23 = vmul.f32 %v920_v20, %v560_v22 }
 0x40d   : > { %v562_v24 = vadd.f32 %v920_v20, %v561_v23 }
 0x40f   : > { %v566_v28 = vsel %vm565_vm12, %v920_v20, %v562_v24  ;;  %v906_v20 = vld [vmem:[%s1113_s7] ss:$0 sm:$0xff] }
 0x410   : > { %v571_v30 = vsel %vm568_vm13, %v570_v29, %v566_v28 }
 0x411   : > { %v572_v33 = vmul.f32 %v916_v11, %v571_v30 }
 0x412   : > { %v681_v47 = vpop.permute.xlu0 %680 }
 0x413   : > { %v691_v49 = vsel %vm359_vm1, %v1066_v0, %v681_v47 }
 0x420   : > { %v637_v26 = vpop.xlane.xlu2 %636 }
 0x421   : > { %921 = vrcp.f32 %v637_v26  ;;  %v649_v35 = vand.u32 2147483648, %v637_v26  ;;  %v647_v37 = vand.u32 2147483647, %v637_v26  ;;  %vm643_vm15 = vweird.f32 %v637_v26 }
 0x422   : > { %923 = vrcp.f32 %v949_v60 }
 0x423   : > { %v650_v39 = vor.u32 1.1754944e-38, %v649_v35  ;;  %vm648_vm3 = vcmp.eq.f32.partialorder %v647_v37, 8.507059e+37 }
 0x427   : > { %v922_v31 = vpop.eup %921 }
 0x428   : > { %v639_v6 = vmul.f32 %v922_v31, %v637_v26  ;;  %v574_v32 = vpop.permute.xlu2 %573  ;;  %vm644_vm14 = vweird.f32 %v922_v31  ;;  %v924_v61 = vpop.eup %923 }
 0x429   : > { %594 = vmatpush.msra.mxu3 %v574_v32  ;;  %vm645_vm2 = vmor %vm643_vm15, %vm644_vm14  ;;  %v740_v62 = vmul.f32 32.0, %v924_v61 }
 0x42a   : > { %v640_v34 = vsub.f32 1.0, %v639_v6  ;;  %860 = vmatmul.msk.f32.vlgmr.msra.gmra.mxu3 %vm359_vm1, %v572_v33 }
 0x42b   : > { %726 = vmatpush.bf16.msrb.mxu3 %v878_v45  ;;  %v741_v63 = vsub.f32 1.0, %v740_v62 }
 0x42c   : > { %v641_v36 = vmul.f32 %v922_v31, %v640_v34 }
 0x42d   : > { %v742_v0 = vmul.f32 %v924_v61, %v741_v63 }
 0x42e   : > { %v642_v38 = vadd.f32 %v922_v31, %v641_v36 }
 0x42f   : > { %727 = vmatpush.bf16.msrb.mxu3 %v877_v46  ;;  %v743_v1 = vadd.f32 %v924_v61, %v742_v0 }
 0x430   : > { %v646_v40 = vsel %vm645_vm2, %v922_v31, %v642_v38 }
 0x431   : > { %v651_v41 = vsel %vm648_vm3, %v650_v39, %v646_v40 }
 0x432   : > { %v652_v42 = vmul.f32 %v918_v13, %v651_v41 }
 0x434   : > { %863 = vmatmul.msk.f32.vlgmr.msra.gmra.mxu1 %vm359_vm1, %v652_v42  ;;  %vm744_vm1 = vweird.f32 %v924_v61 }
 0x435   : > { %v745_v3 = vsel %vm744_vm1, %v924_v61, %v743_v1 }
 0x4ad   : > { %v596_v43 = vpop.f32.mrf.mxu3 }
 0x4ae   : > { %684 = vrot.lane.b32.xlu2 %v596_v43, %s947_s15 }
 0x4b1   : > { %v676_v44 = vpop.f32.mrf.mxu1 }
 0x4b2   : > { %688 = vrot.lane.b32.xlu0 %v676_v44, %s948_s16 }
 0x508   : > { %v685_v48 = vpop.permute.xlu2 %684 }
 0x509   : > { %v693_v50 = vsel %vm692_vm4, %v691_v49, %v685_v48 }
 0x524   : > { %v689_v51 = vpop.permute.xlu0 %688 }
 0x525   : > { %v695_v52 = vsel %vm694_vm5, %v693_v50, %v689_v51 }
 0x526   : > { %v696_v53 = vpack.c.bf16 %v695_v52, %v695_v52 }
 0x528   : > { %872 = vmatmul.msk.bf16.vlgmr.msrb.gmra.mxu3 %vm339_vm0, %v696_v53 }
 0x5ab   : > { %v729_v55 = vpop.f32.mrf.mxu3 }
 0x5ac   : > { %v730_v56 = vadd.f32 %v904_v54, %v729_v55 }
 0x5ae   : > { %v733_v57 = vadd.f32 %v730_v56, %v1021_v2 }
 0x5b0   : > { %v736_v58 = vsel %vm339_vm0, %v733_v57, 0.0 }
 0x5b1   : > { %737 = vadd.xlane.f32.xlu1 %v736_v58 }
 0x5b3   : > { %v731_v59 = vpop.f32.mrf.mxu3 }
 0x624   : > { %v738_v4 = vpop.xlane.xlu1 %737 }
 0x625   : > { %v746_v5 = vmul.f32 %v745_v3, %v738_v4 }
 0x627   : > { %v747_v7 = vsub.f32 %v733_v57, %v746_v5 }
 0x629   : > { %v748_v8 = vmul.f32 %v747_v7, %v747_v7 }
 0x62b   : > { %v749_v9 = vsel %vm339_vm0, %v748_v8, 0.0 }
 0x62c   : > { %750 = vadd.xlane.f32.xlu2 %v749_v9 }
 0x69f   : > { %v751_v2 = vpop.xlane.xlu2 %750 }
 0x6a0   : > { %v752_v10 = vmul.f32 %v751_v2, %v745_v3 }
 0x6a2   : > { %v753_v11 = vadd.f32 1e-12, %v752_v10 }
 0x6a4   : > { %925 = vrsqrt.f32 %v753_v11  ;;  %vm760_vm7 = vweird.f32 %v753_v11 }
 0x6aa   : > { %v926_v12 = vpop.eup %925 }
 0x6ab   : > { %v755_v14 = vmul.f32 %v926_v12, %v753_v11  ;;  %vm761_vm6 = vweird.f32 %v926_v12 }
 0x6ac   : > { %vm762_vm8 = vmor %vm760_vm7, %vm761_vm6 }
 0x6ad   : > { %v756_v15 = vmul.f32 %v926_v12, %v755_v14 }
 0x6af   : > { %v757_v16 = vmul.f32 0.5, %v756_v15 }
 0x6b1   : > { %v758_v13 = vsub.f32 1.5, %v757_v16 }
 0x6b3   : > { %v759_v17 = vmul.f32 %v926_v12, %v758_v13 }
 0x6b5   : > { %v763_v19 = vsel %vm762_vm8, %v926_v12, %v759_v17 }
 0x6b6   : > { %v764_v21 = vmul.f32 %v763_v19, %v747_v7 }
 0x6b8   : > { %v768_v22 = vmul.f32 %v905_v18, %v764_v21 }
 0x6ba   : > { %v772_v23 = vadd.f32 %v906_v20, %v768_v22 }
 0x6bc   : > { %773 = vst.msk [vmem:[%s314_s9] sm:$0xff] %vm339_vm0, %v772_v23 }
 0x6bd PF: > { %s18_s27 = sadd.s32 1, %s933_s27  }
 0x6be   : > { %p15_p4 = scmp.ge.s32.totalorder %s18_s27, 4  }
 0x6c0   :  { %17 = sbr.rel (!%p15_p4) target bundleno = 1 (0x1), region = 85 }

</bundles_post_ra>
